<compile_context>
chip_gen: v7x
topology: tpu7x:2x2x1
jax: 0.10.0
libtpu: 0.0.40
codegen_flags: <defaults>
</compile_context>

<pallas_src>
import jax
import jax.numpy as jnp
from jax.experimental import pallas as pl
from jax.experimental.pallas import tpu as pltpu


def _text_encoder_kernel(hidden_ref, mask_ref, w_ref, b_ref, out_ref,
                         acc_ref, den_ref):
    # hidden_ref: [tb, ts, H]    BERT hidden-state tile (native dtype)
    # mask_ref:   [tb, 1, ts]    attention-mask tile (same dtype as hidden)
    # w_ref:      [H, 3]  f32    hidden_to_score weight (transposed)
    # b_ref:      [1, 3]  f32    hidden_to_score bias
    # out_ref:    [1, tb, 3] f32 log-softmax scores for this batch block
    # acc_ref:    [tb, 1, H] f32 running masked sum over the sequence
    # den_ref:    [tb, 1, 1] f32 running mask sum (valid-token count)
    s = pl.program_id(1)
    ns = pl.num_programs(1)

    @pl.when(s == 0)
    def _init():
        acc_ref[...] = jnp.zeros_like(acc_ref)
        den_ref[...] = jnp.zeros_like(den_ref)

    h = hidden_ref[...]            # [tb, ts, H]
    m = mask_ref[...]              # [tb, 1, ts]

    # Fused mask + sum-pool on the MXU: [tb,1,ts] @ [tb,ts,H] -> [tb,1,H].
    acc_ref[...] += jnp.einsum("bks,bsh->bkh", m, h,
                               preferred_element_type=jnp.float32)
    den_ref[...] += jnp.sum(m.astype(jnp.float32), axis=2, keepdims=True)

    @pl.when(s == ns - 1)
    def _finalize():
        # NOTE: like the PyTorch module, an all-zero mask row gives 0/0 = NaN.
        pooled = (acc_ref[...] / den_ref[...])[:, 0, :]          # [tb, H]
        scores = jnp.dot(pooled, w_ref[...],
                         preferred_element_type=jnp.float32) + b_ref[...]
        mx = jnp.max(scores, axis=1, keepdims=True)
        shifted = scores - mx
        lse = jnp.log(jnp.sum(jnp.exp(shifted), axis=1, keepdims=True))
        out_ref[0] = shifted - lse


def _pick_seq_tile(S, preferred):
    """Largest multiple of 128 that divides S and is <= preferred, else S."""
    t = min(preferred, S)
    t -= t % 128
    while t >= 128:
        if S % t == 0:
            return t
        t -= 128
    return S  # small / awkward S: take the whole sequence per step


def _pick_batch_tile(B):
    for t in (8, 4, 2, 1):
        if B % t == 0:
            return t
    return 1


def text_encoder_forward(bert_output, attention_mask, weight, bias,
                         *, seq_tile=256):
    """bert_output: [B,S,H] (f32 or bf16 — streamed in its native dtype),
    attention_mask: [B,S] 0/1 mask (any int/float dtype),
    weight: [3,H] (PyTorch Linear layout), bias: [3]."""
    B, S, H = bert_output.shape
    dtype = bert_output.dtype

    tb = _pick_batch_tile(B)
    ts = _pick_seq_tile(S, seq_tile)
    nb, ns = B // tb, S // ts

    # Mask laid out [B, 1, S]: contraction dim on lanes -> natural MXU LHS.
    mask3 = attention_mask.astype(dtype).reshape(B, 1, S)
    w_t = jnp.asarray(weight, jnp.float32).T          # [H, 3]
    b2d = jnp.asarray(bias, jnp.float32).reshape(1, 3)

    itemsize = jnp.dtype(dtype).itemsize
    cost = pl.CostEstimate(
        flops=2 * B * S * H + 2 * B * H * 3,
        transcendentals=4 * B,
        bytes_accessed=(B * S * H + B * S) * itemsize
        + (H * 3 + 3 + B * 3) * 4,
    )

    out = pl.pallas_call(
        _text_encoder_kernel,
        out_shape=jax.ShapeDtypeStruct((nb, tb, 3), jnp.float32),
        grid_spec=pltpu.PrefetchScalarGridSpec(
            num_scalar_prefetch=0,
            grid=(nb, ns),
            in_specs=[
                pl.BlockSpec((tb, ts, H), lambda b, s: (b, s, 0)),
                pl.BlockSpec((tb, 1, ts), lambda b, s: (b, 0, s)),
                pl.BlockSpec((H, 3), lambda b, s: (0, 0)),
                pl.BlockSpec((1, 3), lambda b, s: (0, 0)),
            ],
            out_specs=pl.BlockSpec((1, tb, 3), lambda b, s: (b, 0, 0)),
            scratch_shapes=[
                pltpu.VMEM((tb, 1, H), jnp.float32),   # pooled-sum accumulator
                pltpu.VMEM((tb, 1, 1), jnp.float32),   # mask-count accumulator
            ],
        ),
        compiler_params=pltpu.CompilerParams(
            dimension_semantics=("parallel", "arbitrary")),
        cost_estimate=cost,
    )(bert_output, mask3, w_t, b2d)

    return out.reshape(B, 3)


if __name__ == "__main__":
    # Small BERT-like shapes that still exercise the (batch, seq) grid:
    # batch=16 -> 2 batch blocks of 8, seq=256 -> 2 seq tiles of 128, hidden=32.
    B, S, H = 16, 256, 32
    key = jax.random.PRNGKey(0)
    k1, k2, k3, k4 = jax.random.split(key, 4)

    # Synthetic "BERT last hidden state".
    bert_output = jax.random.normal(k1, (B, S, H), dtype=jnp.float32)

    # Variable-length 0/1 attention masks (at least one valid token per row).
    lens = jax.random.randint(k4, (B,), minval=1, maxval=S + 1)
    attention_mask = (jnp.arange(S)[None, :] < lens[:, None]).astype(jnp.int32)

    # Deterministic parameters for hidden_to_score = Linear(H, 3).
    weight = 0.02 * jax.random.normal(k2, (3, H), dtype=jnp.float32)  # torch [out, in]
    bias = 0.01 * jax.random.normal(k3, (3,), dtype=jnp.float32)

    out = text_encoder_forward(bert_output, attention_mask, weight, bias,
                               seq_tile=128)
    out = jax.block_until_ready(out)

    # Pure-JAX reference of the same math.
    m = attention_mask.astype(jnp.float32)
    pooled = (bert_output * m[:, :, None]).sum(axis=1) / m.sum(axis=1, keepdims=True)
    scores = pooled @ weight.T + bias
    ref = jax.nn.log_softmax(scores, axis=1)
    assert jnp.allclose(out, ref, atol=1e-4, rtol=1e-4), (out, ref)

    print("KERNEL_OK")
</pallas_src>

<mosaic_0001>
module attributes {stable_mosaic.version = 11 : i64} {
  func.func @_text_encoder_kernel(%arg0: i32, %arg1: i32, %arg2: memref<8x128x32xf32, #tpu.memory_space<vmem>>, %arg3: memref<8x1x128xf32, #tpu.memory_space<vmem>>, %arg4: memref<32x3xf32, #tpu.memory_space<vmem>>, %arg5: memref<1x3xf32, #tpu.memory_space<vmem>>, %arg6: memref<1x8x3xf32, #tpu.memory_space<vmem>>, %arg7: memref<8x1x32xf32, #tpu.memory_space<vmem>>, %arg8: memref<8x1x1xf32, #tpu.memory_space<vmem>>) attributes {dimension_semantics = [#tpu.dimension_semantics<parallel>, #tpu.dimension_semantics<arbitrary>], iteration_bounds = array<i64: 2, 2>, scalar_prefetch = 0 : i64, scratch_operands = 2 : i64, tpu.core_type = #tpu.core_type<tc>, window_params = [{transform_indices = @transform_0, window_bounds = array<i64: 8, 128, 32>}, {transform_indices = @transform_1, window_bounds = array<i64: 8, 1, 128>}, {pipeline_mode = #tpu.pipeline_mode<synchronous>, transform_indices = @transform_2, window_bounds = array<i64: 32, 3>}, {pipeline_mode = #tpu.pipeline_mode<synchronous>, transform_indices = @transform_3, window_bounds = array<i64: 1, 3>}, {transform_indices = @transform_4, window_bounds = array<i64: 1, 8, 3>}]} {
    %c0_i32 = arith.constant 0 : i32
    %0 = arith.cmpi eq, %arg1, %c0_i32 : i32
    %1 = arith.extui %0 : i1 to i32
    %c0_i32_0 = arith.constant 0 : i32
    %2 = arith.cmpi ne, %1, %c0_i32_0 : i32
    scf.if %2 {
      %cst_20 = arith.constant 0.000000e+00 : f32
      %17 = vector.broadcast %cst_20 : f32 to vector<8x1x32xf32>
      %c0_21 = arith.constant 0 : index
      %c0_22 = arith.constant 0 : index
      %c0_23 = arith.constant 0 : index
      %18 = vector.load %arg7[%c0_21, %c0_22, %c0_23] : memref<8x1x32xf32, #tpu.memory_space<vmem>>, vector<8x1x32xf32>
      tpu.vector_store %arg7[%c0_21, %c0_22, %c0_23], %17 {strides = array<i32>} : memref<8x1x32xf32, #tpu.memory_space<vmem>>, vector<8x1x32xf32>,
      %cst_24 = arith.constant 0.000000e+00 : f32
      %19 = vector.broadcast %cst_24 : f32 to vector<8x1x1xf32>
      %c0_25 = arith.constant 0 : index
      %c0_26 = arith.constant 0 : index
      %c0_27 = arith.constant 0 : index
      %20 = vector.load %arg8[%c0_25, %c0_26, %c0_27] : memref<8x1x1xf32, #tpu.memory_space<vmem>>, vector<8x1x1xf32>
      tpu.vector_store %arg8[%c0_25, %c0_26, %c0_27], %19 {strides = array<i32>} : memref<8x1x1xf32, #tpu.memory_space<vmem>>, vector<8x1x1xf32>,
    } else {
    }
    %c0 = arith.constant 0 : index
    %c0_1 = arith.constant 0 : index
    %c0_2 = arith.constant 0 : index
    %3 = vector.load %arg2[%c0, %c0_1, %c0_2] : memref<8x128x32xf32, #tpu.memory_space<vmem>>, vector<8x128x32xf32>
    %c0_3 = arith.constant 0 : index
    %c0_4 = arith.constant 0 : index
    %c0_5 = arith.constant 0 : index
    %4 = vector.load %arg3[%c0_3, %c0_4, %c0_5] : memref<8x1x128xf32, #tpu.memory_space<vmem>>, vector<8x1x128xf32>
    %c0_6 = arith.constant 0 : index
    %c0_7 = arith.constant 0 : index
    %c0_8 = arith.constant 0 : index
    %5 = vector.load %arg7[%c0_6, %c0_7, %c0_8] : memref<8x1x32xf32, #tpu.memory_space<vmem>>, vector<8x1x32xf32>
    "tpu.trace_start"() <{level = 10 : i32, message = "bks,bsh->bkh"}> : () -> ()
    %cst = arith.constant dense<0.000000e+00> : vector<8x1x32xf32>
    %6 = tpu.matmul %4, %3, %cst {dimension_numbers = #tpu.dot_dimension_numbers<[2], [1], [1], [2], [0, 0, 0, 1, 1, 2], [0], [0]>} : vector<8x1x128xf32>, vector<8x128x32xf32>, vector<8x1x32xf32> -> vector<8x1x32xf32>
    "tpu.trace_stop"() : () -> ()
    %7 = arith.addf %5, %6 : vector<8x1x32xf32>
    %c0_9 = arith.constant 0 : index
    %c0_10 = arith.constant 0 : index
    %c0_11 = arith.constant 0 : index
    %8 = vector.load %arg7[%c0_9, %c0_10, %c0_11] : memref<8x1x32xf32, #tpu.memory_space<vmem>>, vector<8x1x32xf32>
    tpu.vector_store %arg7[%c0_9, %c0_10, %c0_11], %7 {strides = array<i32>} : memref<8x1x32xf32, #tpu.memory_space<vmem>>, vector<8x1x32xf32>,
    %c0_12 = arith.constant 0 : index
    %c0_13 = arith.constant 0 : index
    %c0_14 = arith.constant 0 : index
    %9 = vector.load %arg8[%c0_12, %c0_13, %c0_14] : memref<8x1x1xf32, #tpu.memory_space<vmem>>, vector<8x1x1xf32>
    %cst_15 = arith.constant dense<0.000000e+00> : vector<8x1xf32>
    %10 = vector.multi_reduction <add>, %4, %cst_15 [2] : vector<8x1x128xf32> to vector<8x1xf32>
    %11 = vector.shape_cast %10 : vector<8x1xf32> to vector<8x1x1xf32>
    %12 = arith.addf %9, %11 : vector<8x1x1xf32>
    %c0_16 = arith.constant 0 : index
    %c0_17 = arith.constant 0 : index
    %c0_18 = arith.constant 0 : index
    %13 = vector.load %arg8[%c0_16, %c0_17, %c0_18] : memref<8x1x1xf32, #tpu.memory_space<vmem>>, vector<8x1x1xf32>
    tpu.vector_store %arg8[%c0_16, %c0_17, %c0_18], %12 {strides = array<i32>} : memref<8x1x1xf32, #tpu.memory_space<vmem>>, vector<8x1x1xf32>,
    %c1_i32 = arith.constant 1 : i32
    %14 = arith.cmpi eq, %arg1, %c1_i32 : i32
    %15 = arith.extui %14 : i1 to i32
    %c0_i32_19 = arith.constant 0 : i32
    %16 = arith.cmpi ne, %15, %c0_i32_19 : i32
    scf.if %16 {
      %c0_20 = arith.constant 0 : index
      %c0_21 = arith.constant 0 : index
      %c0_22 = arith.constant 0 : index
      %17 = vector.load %arg7[%c0_20, %c0_21, %c0_22] : memref<8x1x32xf32, #tpu.memory_space<vmem>>, vector<8x1x32xf32>
      %c0_23 = arith.constant 0 : index
      %c0_24 = arith.constant 0 : index
      %c0_25 = arith.constant 0 : index
      %18 = vector.load %arg8[%c0_23, %c0_24, %c0_25] : memref<8x1x1xf32, #tpu.memory_space<vmem>>, vector<8x1x1xf32>
      %19 = vector.broadcast %18 : vector<8x1x1xf32> to vector<8x1x32xf32>
      %20 = arith.divf %17, %19 : vector<8x1x32xf32>
      %21 = vector.shape_cast %20 : vector<8x1x32xf32> to vector<8x32xf32>
      %c0_26 = arith.constant 0 : index
      %c0_27 = arith.constant 0 : index
      %22 = vector.load %arg4[%c0_26, %c0_27] : memref<32x3xf32, #tpu.memory_space<vmem>>, vector<32x3xf32>
      %cst_28 = arith.constant dense<0.000000e+00> : vector<8x3xf32>
      %23 = tpu.matmul %21, %22, %cst_28 {dimension_numbers = #tpu.dot_dimension_numbers<[1], [0], [0], [1], [0, 0, 1, 1], [], []>} : vector<8x32xf32>, vector<32x3xf32>, vector<8x3xf32> -> vector<8x3xf32>
      %c0_29 = arith.constant 0 : index
      %c0_30 = arith.constant 0 : index
      %24 = vector.load %arg5[%c0_29, %c0_30] : memref<1x3xf32, #tpu.memory_space<vmem>>, vector<1x3xf32>
      %25 = vector.broadcast %24 : vector<1x3xf32> to vector<8x3xf32>
      %26 = arith.addf %23, %25 : vector<8x3xf32>
      %cst_31 = arith.constant dense<0xFF800000> : vector<8xf32>
      %27 = vector.multi_reduction <maximumf>, %26, %cst_31 [1] : vector<8x3xf32> to vector<8xf32>
      %28 = vector.shape_cast %27 : vector<8xf32> to vector<8x1xf32>
      %29 = vector.broadcast %28 : vector<8x1xf32> to vector<8x3xf32>
      %30 = arith.subf %26, %29 : vector<8x3xf32>
      %31 = math.exp %30 : vector<8x3xf32>
      %cst_32 = arith.constant dense<0.000000e+00> : vector<8xf32>
      %32 = vector.multi_reduction <add>, %31, %cst_32 [1] : vector<8x3xf32> to vector<8xf32>
      %33 = vector.shape_cast %32 : vector<8xf32> to vector<8x1xf32>
      %34 = math.log %33 : vector<8x1xf32>
      %35 = vector.broadcast %34 : vector<8x1xf32> to vector<8x3xf32>
      %36 = arith.subf %30, %35 : vector<8x3xf32>
      %c0_33 = arith.constant 0 : index
      %c0_34 = arith.constant 0 : index
      %c0_35 = arith.constant 0 : index
      %37 = vector.load %arg6[%c0_33, %c0_34, %c0_35] : memref<1x8x3xf32, #tpu.memory_space<vmem>>, vector<1x8x3xf32>
      %38 = vector.shape_cast %37 : vector<1x8x3xf32> to vector<8x3xf32>
      %39 = vector.shape_cast %36 : vector<8x3xf32> to vector<1x8x3xf32>
      tpu.vector_store %arg6[%c0_33, %c0_34, %c0_35], %39 {strides = array<i32>} : memref<1x8x3xf32, #tpu.memory_space<vmem>>, vector<1x8x3xf32>,
    } else {
    }
    return
  }
  func.func @transform_0(%arg0: i32, %arg1: i32) -> (i32, i32, i32) {
    %c0_i32 = arith.constant 0 : i32
    %c0_i32_0 = arith.constant 0 : i32
    return %arg0, %arg1, %c0_i32 : i32, i32, i32
  }
  func.func @transform_1(%arg0: i32, %arg1: i32) -> (i32, i32, i32) {
    %c0_i32 = arith.constant 0 : i32
    %c0_i32_0 = arith.constant 0 : i32
    return %arg0, %c0_i32, %arg1 : i32, i32, i32
  }
  func.func @transform_2(%arg0: i32, %arg1: i32) -> (i32, i32) {
    %c0_i32 = arith.constant 0 : i32
    %c0_i32_0 = arith.constant 0 : i32
    %c0_i32_1 = arith.constant 0 : i32
    return %c0_i32, %c0_i32_0 : i32, i32
  }
  func.func @transform_3(%arg0: i32, %arg1: i32) -> (i32, i32) {
    %c0_i32 = arith.constant 0 : i32
    %c0_i32_0 = arith.constant 0 : i32
    %c0_i32_1 = arith.constant 0 : i32
    return %c0_i32, %c0_i32_0 : i32, i32
  }
  func.func @transform_4(%arg0: i32, %arg1: i32) -> (i32, i32, i32) {
    %c0_i32 = arith.constant 0 : i32
    %c0_i32_0 = arith.constant 0 : i32
    %c0_i32_1 = arith.constant 0 : i32
    return %arg0, %c0_i32, %c0_i32_0 : i32, i32, i32
  }
}

</mosaic_0001>

<bundles_post_ra>
// kernel: tpu_custom_call.1
= control target key start
LH: loop header
LB: loop body
LE: loop exit
PB: predicated region body
PF: predicated region fallthrough
CT: control target
= control target key end

     0   :  { %s2831_s15 = smov 0   ;;  %s2833_s16 = smov 0   ;;  %s3497_s0 = inlined_call_operand.vmem [shape: f32[16,256,32], index: 0, kind: input, shape index: {}]   ;;  %s3498_s1 = inlined_call_operand.vmem [shape: f32[16,1,256], index: 1, kind: input, shape index: {}]   ;;  %s3499_s2 = inlined_call_operand.vmem [shape: f32[32,3], index: 2, kind: input, shape index: {}]   ;;  %s3500_s3 = inlined_call_operand.vmem [shape: f32[1,3], index: 3, kind: input, shape index: {}]   ;;  %s3501_s4 = inlined_call_operand.vmem [shape: f32[2,8,3], index: 4, kind: output, shape index: {}]  }
   0x1   :  { %s2835_s17 = smov 0   ;;  %s2837_s18 = smov 0  }
   0x2   :  { %s2839_s19 = smov 0   ;;  %s2841_s20 = smov 0  }
   0x3   :  { %s2843_s21 = smov 0  }
   0x4 LB: > { %s23_s22 = sadd.s32 1, %s2787_s19  ;;  %s26_s23 = sadd.s32 1, %s2791_s20  ;;  %s2795_s21 = sphi %s2843_s21, %s14_s21   ;;  %s2791_s20 = sphi %s2841_s20, %s3508_s20   ;;  %s2787_s19 = sphi %s2839_s19, %s3507_s19   ;;  %s2783_s18 = sphi %s2837_s18, %s3506_s18   ;;  %s2779_s17 = sphi %s2835_s17, %s3505_s17   ;;  %s2775_s16 = sphi %s2833_s16, %s3504_s16   ;;  %s2771_s15 = sphi %s2831_s15, %s3503_s15  }
   0x5   : > { %p24_p0 = scmp.ge.s32.totalorder %s23_s22, 2  ;;  %p42_p1 = scmp.ne.s32.totalorder %s2775_s16, %s2771_s15 }
   0x6   : > { %p43_p2 = scmp.eq.s32.totalorder %s2795_s21, 0  ;;  %s35_s28 = sadd.s32 1, %s2775_s16 }
   0x7   : > { %s3510_s22 = smov (%p24_p0, %s23_s22), 0  ;;  %s3512_s23 = smov (!%p24_p0, %s26_s23), %s2791_s20 }
   0x8   : > { %p2874_p3 = por %p43_p2, %p42_p1  ;;  %p28_p4 = scmp.ge.s32.totalorder %s3512_s23, 2 }
   0x9   : > { %s31_s25 = ssub.s32 %s2787_s19, %s3510_s22  ;;  %p2003_p6 = scmp.ge.s32.totalorder %s2795_s21, 4 }
   0xa   : > { %s3514_s23 = smov (%p28_p4, %s3512_s23), 0 }
   0xb   : > { %s30_s26 = ssub.s32 %s2791_s20, %s3514_s23  ;;  %170 = sbr.rel (%p2003_p6) target bundleno = 99 (0x63), region = 24 }
   0xc   : > { %s32_s27 = sor.u32 %s31_s25, %s30_s26 }
   0xd   : > { %p33_p5 = scmp.eq.s32.totalorder %s32_s27, 0 }
   0xf   : > { %s2886_s29 = scalar_select %p33_p5, %s2775_s16, %s35_s28  }
  0x12   : > { %173 = sbr.rel (!%p2874_p3) target bundleno = 89 (0x59), region = 28  ;;  %s175_s30 = sand.u32 (%p2874_p3), 1, %s2775_s16  }
  0x13   : > { %s2006_s5 = sshll.u32 (%p2874_p3), %s2787_s19, 4  ;;  %s2004_s6 = sshll.u32 (%p2874_p3), %s175_s30, 10 }
  0x14   : > { %s2022_s7 = sshll.u32 (%p2874_p3), %s2791_s20, 8  ;;  %s2902_s13 = scalar_lea.vmem (%p2874_p3), [#allocation4], %s2004_s6 }
  0x15   : > { %s181_s8 = sadd.s32 (%p2874_p3), %s2022_s7, %s2006_s5 }
  0x16   : > { %s2008_s9 = sshll.u32 (%p2874_p3), %s181_s8, 3 }
  0x17   : > { %s2897_s12 = scalar_lea.vmem (%p2874_p3), %s3497_s0, %s2008_s9 }
  0x18   : > { %v465_v0 = vld [vmem:[%s2897_s12] sm:$0xff] (%p2874_p3)  ;;  %v467_v1 = vld [vmem:[%s2897_s12 + $0x8] sm:$0xff] (%p2874_p3)  ;;  %v469_v2 = vld [vmem:[%s2897_s12 + $0x10] sm:$0xff] (%p2874_p3) }
  0x19   : > { %466 = vst [vmem:[%s2902_s13] sm:$0xff] %v465_v0  ;;  %468 = vst [vmem:[%s2902_s13 + $0x8] sm:$0xff] %v467_v1  ;;  %v471_v3 = vld [vmem:[%s2897_s12 + $0x18] sm:$0xff]  ;;  %v473_v4 = vld [vmem:[%s2897_s12 + $0x20] sm:$0xff] }
  0x1a   : > { %470 = vst [vmem:[%s2902_s13 + $0x10] sm:$0xff] %v469_v2  ;;  %v475_v5 = vld [vmem:[%s2897_s12 + $0x28] sm:$0xff]  ;;  %472 = vst [vmem:[%s2902_s13 + $0x18] sm:$0xff] %v471_v3  ;;  %v477_v6 = vld [vmem:[%s2897_s12 + $0x30] sm:$0xff] }
  0x1b   : > { %474 = vst [vmem:[%s2902_s13 + $0x20] sm:$0xff] %v473_v4  ;;  %476 = vst [vmem:[%s2902_s13 + $0x28] sm:$0xff] %v475_v5  ;;  %v479_v7 = vld [vmem:[%s2897_s12 + $0x38] sm:$0xff]  ;;  %v481_v8 = vld [vmem:[%s2897_s12 + $0x40] sm:$0xff] }
  0x1c   : > { %478 = vst [vmem:[%s2902_s13 + $0x30] sm:$0xff] %v477_v6  ;;  %480 = vst [vmem:[%s2902_s13 + $0x38] sm:$0xff] %v479_v7  ;;  %v483_v9 = vld [vmem:[%s2897_s12 + $0x48] sm:$0xff]  ;;  %v485_v10 = vld [vmem:[%s2897_s12 + $0x50] sm:$0xff] }
  0x1d   : > { %482 = vst [vmem:[%s2902_s13 + $0x40] sm:$0xff] %v481_v8  ;;  %v487_v11 = vld [vmem:[%s2897_s12 + $0x58] sm:$0xff]  ;;  %484 = vst [vmem:[%s2902_s13 + $0x48] sm:$0xff] %v483_v9  ;;  %v489_v12 = vld [vmem:[%s2897_s12 + $0x60] sm:$0xff] }
  0x1e   : > { %486 = vst [vmem:[%s2902_s13 + $0x50] sm:$0xff] %v485_v10  ;;  %488 = vst [vmem:[%s2902_s13 + $0x58] sm:$0xff] %v487_v11  ;;  %v491_v13 = vld [vmem:[%s2897_s12 + $0x68] sm:$0xff]  ;;  %v493_v14 = vld [vmem:[%s2897_s12 + $0x70] sm:$0xff] }
  0x1f   : > { %490 = vst [vmem:[%s2902_s13 + $0x60] sm:$0xff] %v489_v12  ;;  %492 = vst [vmem:[%s2902_s13 + $0x68] sm:$0xff] %v491_v13  ;;  %v495_v15 = vld [vmem:[%s2897_s12 + $0x78] sm:$0xff]  ;;  %v497_v16 = vld [vmem:[%s2897_s12 + $0x100] sm:$0xff] }
  0x20   : > { %494 = vst [vmem:[%s2902_s13 + $0x70] sm:$0xff] %v493_v14  ;;  %v499_v17 = vld [vmem:[%s2897_s12 + $0x108] sm:$0xff]  ;;  %496 = vst [vmem:[%s2902_s13 + $0x78] sm:$0xff] %v495_v15  ;;  %v501_v18 = vld [vmem:[%s2897_s12 + $0x110] sm:$0xff] }
  0x21   : > { %498 = vst [vmem:[%s2902_s13 + $0x80] sm:$0xff] %v497_v16  ;;  %500 = vst [vmem:[%s2902_s13 + $0x88] sm:$0xff] %v499_v17  ;;  %v503_v19 = vld [vmem:[%s2897_s12 + $0x118] sm:$0xff]  ;;  %v505_v20 = vld [vmem:[%s2897_s12 + $0x120] sm:$0xff] }
  0x22   : > { %502 = vst [vmem:[%s2902_s13 + $0x90] sm:$0xff] %v501_v18  ;;  %504 = vst [vmem:[%s2902_s13 + $0x98] sm:$0xff] %v503_v19  ;;  %v507_v21 = vld [vmem:[%s2897_s12 + $0x128] sm:$0xff]  ;;  %v509_v22 = vld [vmem:[%s2897_s12 + $0x130] sm:$0xff] }
  0x23   : > { %506 = vst [vmem:[%s2902_s13 + $0xa0] sm:$0xff] %v505_v20  ;;  %v511_v23 = vld [vmem:[%s2897_s12 + $0x138] sm:$0xff]  ;;  %508 = vst [vmem:[%s2902_s13 + $0xa8] sm:$0xff] %v507_v21  ;;  %v513_v24 = vld [vmem:[%s2897_s12 + $0x140] sm:$0xff] }
  0x24   : > { %510 = vst [vmem:[%s2902_s13 + $0xb0] sm:$0xff] %v509_v22  ;;  %512 = vst [vmem:[%s2902_s13 + $0xb8] sm:$0xff] %v511_v23  ;;  %v515_v25 = vld [vmem:[%s2897_s12 + $0x148] sm:$0xff]  ;;  %v517_v26 = vld [vmem:[%s2897_s12 + $0x150] sm:$0xff] }
  0x25   : > { %514 = vst [vmem:[%s2902_s13 + $0xc0] sm:$0xff] %v513_v24  ;;  %516 = vst [vmem:[%s2902_s13 + $0xc8] sm:$0xff] %v515_v25  ;;  %v519_v27 = vld [vmem:[%s2897_s12 + $0x158] sm:$0xff]  ;;  %v521_v28 = vld [vmem:[%s2897_s12 + $0x160] sm:$0xff] }
  0x26   : > { %518 = vst [vmem:[%s2902_s13 + $0xd0] sm:$0xff] %v517_v26  ;;  %v523_v29 = vld [vmem:[%s2897_s12 + $0x168] sm:$0xff]  ;;  %520 = vst [vmem:[%s2902_s13 + $0xd8] sm:$0xff] %v519_v27  ;;  %v525_v30 = vld [vmem:[%s2897_s12 + $0x170] sm:$0xff] }
  0x27   : > { %522 = vst [vmem:[%s2902_s13 + $0xe0] sm:$0xff] %v521_v28  ;;  %524 = vst [vmem:[%s2902_s13 + $0xe8] sm:$0xff] %v523_v29  ;;  %v527_v31 = vld [vmem:[%s2897_s12 + $0x178] sm:$0xff]  ;;  %v529_v32 = vld [vmem:[%s2897_s12 + $0x200] sm:$0xff] }
  0x28   : > { %526 = vst [vmem:[%s2902_s13 + $0xf0] sm:$0xff] %v525_v30  ;;  %528 = vst [vmem:[%s2902_s13 + $0xf8] sm:$0xff] %v527_v31  ;;  %v531_v33 = vld [vmem:[%s2897_s12 + $0x208] sm:$0xff]  ;;  %v533_v34 = vld [vmem:[%s2897_s12 + $0x210] sm:$0xff] }
  0x29   : > { %530 = vst [vmem:[%s2902_s13 + $0x100] sm:$0xff] %v529_v32  ;;  %v535_v35 = vld [vmem:[%s2897_s12 + $0x218] sm:$0xff]  ;;  %532 = vst [vmem:[%s2902_s13 + $0x108] sm:$0xff] %v531_v33  ;;  %v537_v36 = vld [vmem:[%s2897_s12 + $0x220] sm:$0xff] }
  0x2a   : > { %534 = vst [vmem:[%s2902_s13 + $0x110] sm:$0xff] %v533_v34  ;;  %536 = vst [vmem:[%s2902_s13 + $0x118] sm:$0xff] %v535_v35  ;;  %v539_v37 = vld [vmem:[%s2897_s12 + $0x228] sm:$0xff]  ;;  %v541_v38 = vld [vmem:[%s2897_s12 + $0x230] sm:$0xff] }
  0x2b   : > { %538 = vst [vmem:[%s2902_s13 + $0x120] sm:$0xff] %v537_v36  ;;  %540 = vst [vmem:[%s2902_s13 + $0x128] sm:$0xff] %v539_v37  ;;  %v543_v39 = vld [vmem:[%s2897_s12 + $0x238] sm:$0xff]  ;;  %v545_v40 = vld [vmem:[%s2897_s12 + $0x240] sm:$0xff] }
  0x2c   : > { %542 = vst [vmem:[%s2902_s13 + $0x130] sm:$0xff] %v541_v38  ;;  %v547_v41 = vld [vmem:[%s2897_s12 + $0x248] sm:$0xff]  ;;  %544 = vst [vmem:[%s2902_s13 + $0x138] sm:$0xff] %v543_v39  ;;  %v549_v42 = vld [vmem:[%s2897_s12 + $0x250] sm:$0xff] }
  0x2d   : > { %546 = vst [vmem:[%s2902_s13 + $0x140] sm:$0xff] %v545_v40  ;;  %548 = vst [vmem:[%s2902_s13 + $0x148] sm:$0xff] %v547_v41  ;;  %v551_v43 = vld [vmem:[%s2897_s12 + $0x258] sm:$0xff]  ;;  %v553_v44 = vld [vmem:[%s2897_s12 + $0x260] sm:$0xff] }
  0x2e   : > { %550 = vst [vmem:[%s2902_s13 + $0x150] sm:$0xff] %v549_v42  ;;  %552 = vst [vmem:[%s2902_s13 + $0x158] sm:$0xff] %v551_v43  ;;  %v555_v45 = vld [vmem:[%s2897_s12 + $0x268] sm:$0xff]  ;;  %v557_v46 = vld [vmem:[%s2897_s12 + $0x270] sm:$0xff] }
  0x2f   : > { %554 = vst [vmem:[%s2902_s13 + $0x160] sm:$0xff] %v553_v44  ;;  %v559_v47 = vld [vmem:[%s2897_s12 + $0x278] sm:$0xff]  ;;  %556 = vst [vmem:[%s2902_s13 + $0x168] sm:$0xff] %v555_v45  ;;  %v561_v48 = vld [vmem:[%s2897_s12 + $0x300] sm:$0xff] }
  0x30   : > { %558 = vst [vmem:[%s2902_s13 + $0x170] sm:$0xff] %v557_v46  ;;  %560 = vst [vmem:[%s2902_s13 + $0x178] sm:$0xff] %v559_v47  ;;  %v563_v49 = vld [vmem:[%s2897_s12 + $0x308] sm:$0xff]  ;;  %v565_v50 = vld [vmem:[%s2897_s12 + $0x310] sm:$0xff] }
  0x31   : > { %562 = vst [vmem:[%s2902_s13 + $0x180] sm:$0xff] %v561_v48  ;;  %564 = vst [vmem:[%s2902_s13 + $0x188] sm:$0xff] %v563_v49  ;;  %v567_v51 = vld [vmem:[%s2897_s12 + $0x318] sm:$0xff]  ;;  %v569_v52 = vld [vmem:[%s2897_s12 + $0x320] sm:$0xff] }
  0x32   : > { %566 = vst [vmem:[%s2902_s13 + $0x190] sm:$0xff] %v565_v50  ;;  %v571_v53 = vld [vmem:[%s2897_s12 + $0x328] sm:$0xff]  ;;  %568 = vst [vmem:[%s2902_s13 + $0x198] sm:$0xff] %v567_v51  ;;  %v573_v54 = vld [vmem:[%s2897_s12 + $0x330] sm:$0xff] }
  0x33   : > { %570 = vst [vmem:[%s2902_s13 + $0x1a0] sm:$0xff] %v569_v52  ;;  %572 = vst [vmem:[%s2902_s13 + $0x1a8] sm:$0xff] %v571_v53  ;;  %v575_v55 = vld [vmem:[%s2897_s12 + $0x338] sm:$0xff]  ;;  %v577_v56 = vld [vmem:[%s2897_s12 + $0x340] sm:$0xff] }
  0x34   : > { %574 = vst [vmem:[%s2902_s13 + $0x1b0] sm:$0xff] %v573_v54  ;;  %576 = vst [vmem:[%s2902_s13 + $0x1b8] sm:$0xff] %v575_v55  ;;  %v579_v57 = vld [vmem:[%s2897_s12 + $0x348] sm:$0xff]  ;;  %v581_v58 = vld [vmem:[%s2897_s12 + $0x350] sm:$0xff] }
  0x35   : > { %578 = vst [vmem:[%s2902_s13 + $0x1c0] sm:$0xff] %v577_v56  ;;  %v583_v59 = vld [vmem:[%s2897_s12 + $0x358] sm:$0xff]  ;;  %580 = vst [vmem:[%s2902_s13 + $0x1c8] sm:$0xff] %v579_v57  ;;  %v585_v60 = vld [vmem:[%s2897_s12 + $0x360] sm:$0xff] }
  0x36   : > { %582 = vst [vmem:[%s2902_s13 + $0x1d0] sm:$0xff] %v581_v58  ;;  %584 = vst [vmem:[%s2902_s13 + $0x1d8] sm:$0xff] %v583_v59  ;;  %v587_v61 = vld [vmem:[%s2897_s12 + $0x368] sm:$0xff]  ;;  %v589_v62 = vld [vmem:[%s2897_s12 + $0x370] sm:$0xff] }
  0x37   : > { %586 = vst [vmem:[%s2902_s13 + $0x1e0] sm:$0xff] %v585_v60  ;;  %588 = vst [vmem:[%s2902_s13 + $0x1e8] sm:$0xff] %v587_v61  ;;  %v591_v63 = vld [vmem:[%s2897_s12 + $0x378] sm:$0xff]  ;;  %v593_v0 = vld [vmem:[%s2897_s12 + $0x400] sm:$0xff] }
  0x38   : > { %590 = vst [vmem:[%s2902_s13 + $0x1f0] sm:$0xff] %v589_v62  ;;  %v595_v1 = vld [vmem:[%s2897_s12 + $0x408] sm:$0xff]  ;;  %592 = vst [vmem:[%s2902_s13 + $0x1f8] sm:$0xff] %v591_v63  ;;  %v597_v2 = vld [vmem:[%s2897_s12 + $0x410] sm:$0xff] }
  0x39   : > { %594 = vst [vmem:[%s2902_s13 + $0x200] sm:$0xff] %v593_v0  ;;  %596 = vst [vmem:[%s2902_s13 + $0x208] sm:$0xff] %v595_v1  ;;  %v599_v3 = vld [vmem:[%s2897_s12 + $0x418] sm:$0xff]  ;;  %v601_v4 = vld [vmem:[%s2897_s12 + $0x420] sm:$0xff] }
  0x3a   : > { %598 = vst [vmem:[%s2902_s13 + $0x210] sm:$0xff] %v597_v2  ;;  %600 = vst [vmem:[%s2902_s13 + $0x218] sm:$0xff] %v599_v3  ;;  %v603_v5 = vld [vmem:[%s2897_s12 + $0x428] sm:$0xff]  ;;  %v605_v6 = vld [vmem:[%s2897_s12 + $0x430] sm:$0xff] }
  0x3b   : > { %602 = vst [vmem:[%s2902_s13 + $0x220] sm:$0xff] %v601_v4  ;;  %v607_v7 = vld [vmem:[%s2897_s12 + $0x438] sm:$0xff]  ;;  %604 = vst [vmem:[%s2902_s13 + $0x228] sm:$0xff] %v603_v5  ;;  %v609_v8 = vld [vmem:[%s2897_s12 + $0x440] sm:$0xff] }
  0x3c   : > { %606 = vst [vmem:[%s2902_s13 + $0x230] sm:$0xff] %v605_v6  ;;  %608 = vst [vmem:[%s2902_s13 + $0x238] sm:$0xff] %v607_v7  ;;  %v611_v9 = vld [vmem:[%s2897_s12 + $0x448] sm:$0xff]  ;;  %v613_v10 = vld [vmem:[%s2897_s12 + $0x450] sm:$0xff] }
  0x3d   : > { %610 = vst [vmem:[%s2902_s13 + $0x240] sm:$0xff] %v609_v8  ;;  %612 = vst [vmem:[%s2902_s13 + $0x248] sm:$0xff] %v611_v9  ;;  %v615_v11 = vld [vmem:[%s2897_s12 + $0x458] sm:$0xff]  ;;  %v617_v12 = vld [vmem:[%s2897_s12 + $0x460] sm:$0xff] }
  0x3e   : > { %614 = vst [vmem:[%s2902_s13 + $0x250] sm:$0xff] %v613_v10  ;;  %v619_v13 = vld [vmem:[%s2897_s12 + $0x468] sm:$0xff]  ;;  %616 = vst [vmem:[%s2902_s13 + $0x258] sm:$0xff] %v615_v11  ;;  %v621_v14 = vld [vmem:[%s2897_s12 + $0x470] sm:$0xff] }
  0x3f   : > { %618 = vst [vmem:[%s2902_s13 + $0x260] sm:$0xff] %v617_v12  ;;  %620 = vst [vmem:[%s2902_s13 + $0x268] sm:$0xff] %v619_v13  ;;  %v623_v15 = vld [vmem:[%s2897_s12 + $0x478] sm:$0xff]  ;;  %v625_v16 = vld [vmem:[%s2897_s12 + $0x500] sm:$0xff] }
  0x40   : > { %622 = vst [vmem:[%s2902_s13 + $0x270] sm:$0xff] %v621_v14  ;;  %624 = vst [vmem:[%s2902_s13 + $0x278] sm:$0xff] %v623_v15  ;;  %v627_v17 = vld [vmem:[%s2897_s12 + $0x508] sm:$0xff]  ;;  %v629_v18 = vld [vmem:[%s2897_s12 + $0x510] sm:$0xff] }
  0x41   : > { %626 = vst [vmem:[%s2902_s13 + $0x280] sm:$0xff] %v625_v16  ;;  %v631_v19 = vld [vmem:[%s2897_s12 + $0x518] sm:$0xff]  ;;  %628 = vst [vmem:[%s2902_s13 + $0x288] sm:$0xff] %v627_v17  ;;  %v633_v20 = vld [vmem:[%s2897_s12 + $0x520] sm:$0xff] }
  0x42   : > { %630 = vst [vmem:[%s2902_s13 + $0x290] sm:$0xff] %v629_v18  ;;  %632 = vst [vmem:[%s2902_s13 + $0x298] sm:$0xff] %v631_v19  ;;  %v635_v21 = vld [vmem:[%s2897_s12 + $0x528] sm:$0xff]  ;;  %v637_v22 = vld [vmem:[%s2897_s12 + $0x530] sm:$0xff] }
  0x43   : > { %634 = vst [vmem:[%s2902_s13 + $0x2a0] sm:$0xff] %v633_v20  ;;  %636 = vst [vmem:[%s2902_s13 + $0x2a8] sm:$0xff] %v635_v21  ;;  %v639_v23 = vld [vmem:[%s2897_s12 + $0x538] sm:$0xff]  ;;  %v641_v24 = vld [vmem:[%s2897_s12 + $0x540] sm:$0xff] }
  0x44   : > { %638 = vst [vmem:[%s2902_s13 + $0x2b0] sm:$0xff] %v637_v22  ;;  %v643_v25 = vld [vmem:[%s2897_s12 + $0x548] sm:$0xff]  ;;  %640 = vst [vmem:[%s2902_s13 + $0x2b8] sm:$0xff] %v639_v23  ;;  %v645_v26 = vld [vmem:[%s2897_s12 + $0x550] sm:$0xff] }
  0x45   : > { %642 = vst [vmem:[%s2902_s13 + $0x2c0] sm:$0xff] %v641_v24  ;;  %644 = vst [vmem:[%s2902_s13 + $0x2c8] sm:$0xff] %v643_v25  ;;  %v647_v27 = vld [vmem:[%s2897_s12 + $0x558] sm:$0xff]  ;;  %v649_v28 = vld [vmem:[%s2897_s12 + $0x560] sm:$0xff] }
  0x46   : > { %646 = vst [vmem:[%s2902_s13 + $0x2d0] sm:$0xff] %v645_v26  ;;  %648 = vst [vmem:[%s2902_s13 + $0x2d8] sm:$0xff] %v647_v27  ;;  %v651_v29 = vld [vmem:[%s2897_s12 + $0x568] sm:$0xff]  ;;  %v653_v30 = vld [vmem:[%s2897_s12 + $0x570] sm:$0xff] }
  0x47   : > { %650 = vst [vmem:[%s2902_s13 + $0x2e0] sm:$0xff] %v649_v28  ;;  %v655_v31 = vld [vmem:[%s2897_s12 + $0x578] sm:$0xff]  ;;  %652 = vst [vmem:[%s2902_s13 + $0x2e8] sm:$0xff] %v651_v29  ;;  %v657_v32 = vld [vmem:[%s2897_s12 + $0x600] sm:$0xff] }
  0x48   : > { %654 = vst [vmem:[%s2902_s13 + $0x2f0] sm:$0xff] %v653_v30  ;;  %656 = vst [vmem:[%s2902_s13 + $0x2f8] sm:$0xff] %v655_v31  ;;  %v659_v33 = vld [vmem:[%s2897_s12 + $0x608] sm:$0xff]  ;;  %v661_v34 = vld [vmem:[%s2897_s12 + $0x610] sm:$0xff] }
  0x49   : > { %658 = vst [vmem:[%s2902_s13 + $0x300] sm:$0xff] %v657_v32  ;;  %660 = vst [vmem:[%s2902_s13 + $0x308] sm:$0xff] %v659_v33  ;;  %v663_v35 = vld [vmem:[%s2897_s12 + $0x618] sm:$0xff]  ;;  %v665_v36 = vld [vmem:[%s2897_s12 + $0x620] sm:$0xff] }
  0x4a   : > { %662 = vst [vmem:[%s2902_s13 + $0x310] sm:$0xff] %v661_v34  ;;  %v667_v37 = vld [vmem:[%s2897_s12 + $0x628] sm:$0xff]  ;;  %664 = vst [vmem:[%s2902_s13 + $0x318] sm:$0xff] %v663_v35  ;;  %v669_v38 = vld [vmem:[%s2897_s12 + $0x630] sm:$0xff] }
  0x4b   : > { %666 = vst [vmem:[%s2902_s13 + $0x320] sm:$0xff] %v665_v36  ;;  %668 = vst [vmem:[%s2902_s13 + $0x328] sm:$0xff] %v667_v37  ;;  %v671_v39 = vld [vmem:[%s2897_s12 + $0x638] sm:$0xff]  ;;  %v673_v40 = vld [vmem:[%s2897_s12 + $0x640] sm:$0xff] }
  0x4c   : > { %670 = vst [vmem:[%s2902_s13 + $0x330] sm:$0xff] %v669_v38  ;;  %672 = vst [vmem:[%s2902_s13 + $0x338] sm:$0xff] %v671_v39  ;;  %v675_v41 = vld [vmem:[%s2897_s12 + $0x648] sm:$0xff]  ;;  %v677_v42 = vld [vmem:[%s2897_s12 + $0x650] sm:$0xff] }
  0x4d   : > { %674 = vst [vmem:[%s2902_s13 + $0x340] sm:$0xff] %v673_v40  ;;  %v679_v43 = vld [vmem:[%s2897_s12 + $0x658] sm:$0xff]  ;;  %676 = vst [vmem:[%s2902_s13 + $0x348] sm:$0xff] %v675_v41  ;;  %v681_v44 = vld [vmem:[%s2897_s12 + $0x660] sm:$0xff] }
  0x4e   : > { %678 = vst [vmem:[%s2902_s13 + $0x350] sm:$0xff] %v677_v42  ;;  %680 = vst [vmem:[%s2902_s13 + $0x358] sm:$0xff] %v679_v43  ;;  %v683_v45 = vld [vmem:[%s2897_s12 + $0x668] sm:$0xff]  ;;  %v685_v46 = vld [vmem:[%s2897_s12 + $0x670] sm:$0xff] }
  0x4f   : > { %682 = vst [vmem:[%s2902_s13 + $0x360] sm:$0xff] %v681_v44  ;;  %684 = vst [vmem:[%s2902_s13 + $0x368] sm:$0xff] %v683_v45  ;;  %v687_v47 = vld [vmem:[%s2897_s12 + $0x678] sm:$0xff]  ;;  %v689_v48 = vld [vmem:[%s2897_s12 + $0x700] sm:$0xff] }
  0x50   : > { %686 = vst [vmem:[%s2902_s13 + $0x370] sm:$0xff] %v685_v46  ;;  %v691_v49 = vld [vmem:[%s2897_s12 + $0x708] sm:$0xff]  ;;  %688 = vst [vmem:[%s2902_s13 + $0x378] sm:$0xff] %v687_v47  ;;  %v693_v50 = vld [vmem:[%s2897_s12 + $0x710] sm:$0xff] }
  0x51   : > { %690 = vst [vmem:[%s2902_s13 + $0x380] sm:$0xff] %v689_v48  ;;  %692 = vst [vmem:[%s2902_s13 + $0x388] sm:$0xff] %v691_v49  ;;  %v695_v51 = vld [vmem:[%s2897_s12 + $0x718] sm:$0xff]  ;;  %v697_v52 = vld [vmem:[%s2897_s12 + $0x720] sm:$0xff] }
  0x52   : > { %694 = vst [vmem:[%s2902_s13 + $0x390] sm:$0xff] %v693_v50  ;;  %696 = vst [vmem:[%s2902_s13 + $0x398] sm:$0xff] %v695_v51  ;;  %v699_v53 = vld [vmem:[%s2897_s12 + $0x728] sm:$0xff]  ;;  %v701_v54 = vld [vmem:[%s2897_s12 + $0x730] sm:$0xff] }
  0x53   : > { %698 = vst [vmem:[%s2902_s13 + $0x3a0] sm:$0xff] %v697_v52  ;;  %v703_v55 = vld [vmem:[%s2897_s12 + $0x738] sm:$0xff]  ;;  %700 = vst [vmem:[%s2902_s13 + $0x3a8] sm:$0xff] %v699_v53  ;;  %v705_v56 = vld [vmem:[%s2897_s12 + $0x740] sm:$0xff] }
  0x54   : > { %702 = vst [vmem:[%s2902_s13 + $0x3b0] sm:$0xff] %v701_v54  ;;  %704 = vst [vmem:[%s2902_s13 + $0x3b8] sm:$0xff] %v703_v55  ;;  %v707_v57 = vld [vmem:[%s2897_s12 + $0x748] sm:$0xff]  ;;  %v709_v58 = vld [vmem:[%s2897_s12 + $0x750] sm:$0xff] }
  0x55   : > { %706 = vst [vmem:[%s2902_s13 + $0x3c0] sm:$0xff] %v705_v56  ;;  %708 = vst [vmem:[%s2902_s13 + $0x3c8] sm:$0xff] %v707_v57  ;;  %v711_v59 = vld [vmem:[%s2897_s12 + $0x758] sm:$0xff]  ;;  %v713_v60 = vld [vmem:[%s2897_s12 + $0x760] sm:$0xff] }
  0x56   : > { %710 = vst [vmem:[%s2902_s13 + $0x3d0] sm:$0xff] %v709_v58  ;;  %v715_v61 = vld [vmem:[%s2897_s12 + $0x768] sm:$0xff]  ;;  %712 = vst [vmem:[%s2902_s13 + $0x3d8] sm:$0xff] %v711_v59  ;;  %v717_v62 = vld [vmem:[%s2897_s12 + $0x770] sm:$0xff] }
  0x57   : > { %714 = vst [vmem:[%s2902_s13 + $0x3e0] sm:$0xff] %v713_v60  ;;  %716 = vst [vmem:[%s2902_s13 + $0x3e8] sm:$0xff] %v715_v61  ;;  %v719_v63 = vld [vmem:[%s2897_s12 + $0x778] sm:$0xff] }
  0x58   : > { %718 = vst [vmem:[%s2902_s13 + $0x3f0] sm:$0xff] %v717_v62  ;;  %720 = vst [vmem:[%s2902_s13 + $0x3f8] sm:$0xff] %v719_v63 }
  0x59 PF: > { %726 = sbr.rel (!%p2874_p3) target bundleno = 99 (0x63), region = 66  ;;  %s728_s14 = sand.u32 (%p2874_p3), 1, %s2775_s16  }
  0x5a   : > { %s2023_s25 = sshll.u32 (%p2874_p3), %s2791_s20, 4  ;;  %s2009_s26 = sshll.u32 (%p2874_p3), %s728_s14, 3 }
  0x5b   : > { %s733_s27 = sadd.s32 (%p2874_p3), %s2787_s19, %s2023_s25  ;;  %s730_s6 = scalar_lea.vmem (%p2874_p3), [#allocation5], %s2009_s26 }
  0x5c   : > { %s734_s5 = scalar_lea.vmem (%p2874_p3), %s3498_s1, %s733_s27 }
  0x5d   : > { %v750_v0 = vld [vmem:[%s734_s5] sm:$0x1] (%p2874_p3)  ;;  %v752_v1 = vld [vmem:[%s734_s5 + $0x2] sm:$0x1] (%p2874_p3)  ;;  %v754_v2 = vld [vmem:[%s734_s5 + $0x4] sm:$0x1] (%p2874_p3) }
  0x5e   : > { %751 = vst [vmem:[%s730_s6] sm:$0x1] (%p2874_p3), %v750_v0  ;;  %753 = vst [vmem:[%s730_s6 + $0x1] sm:$0x1] (%p2874_p3), %v752_v1  ;;  %v756_v3 = vld [vmem:[%s734_s5 + $0x6] sm:$0x1] (%p2874_p3) }
  0x5f   : > { %755 = vst [vmem:[%s730_s6 + $0x2] sm:$0x1] (%p2874_p3), %v754_v2  ;;  %v758_v4 = vld [vmem:[%s734_s5 + $0x8] sm:$0x1] (%p2874_p3)  ;;  %v760_v5 = vld [vmem:[%s734_s5 + $0xa] sm:$0x1] (%p2874_p3) }
  0x60   : > { %757 = vst [vmem:[%s730_s6 + $0x3] sm:$0x1] %v756_v3  ;;  %759 = vst [vmem:[%s730_s6 + $0x4] sm:$0x1] %v758_v4  ;;  %v762_v6 = vld [vmem:[%s734_s5 + $0xc] sm:$0x1] }
  0x61   : > { %761 = vst [vmem:[%s730_s6 + $0x5] sm:$0x1] %v760_v5  ;;  %v764_v7 = vld [vmem:[%s734_s5 + $0xe] sm:$0x1]  ;;  %763 = vst [vmem:[%s730_s6 + $0x6] sm:$0x1] %v762_v6 }
  0x62   : > { %765 = vst [vmem:[%s730_s6 + $0x7] sm:$0x1] %v764_v7 }
  0x63 PF: > { %p2012_p7 = scmp.ge.s32.totalorder %s2795_s21, 1  ;;  %p803_p8 = scmp.lt.s32.totalorder %s2795_s21, 5 }
  0x65   : > { %p804_p9 = pnand %p2012_p7, %p803_p8 }
  0x66   : > { %s810_s24 = sand.u32 (!%p804_p9), 1, %s2771_s15   ;;  %p848_p10 = scmp.lt.s32.totalorder (!%p804_p9), %s2783_s18, 1 }
  0x67   : > { %807 = sbr.rel (%p804_p9) target bundleno = 1016 (0x3f8), region = 107  ;;  %s2013_s7 = sshll.u32 (!%p804_p9), %s810_s24, 10 }
  0x68   : > { %s2014_s8 = sshll.u32 (!%p804_p9), %s810_s24, 3  ;;  %s3175_s13 = scalar_lea.vmem (!%p804_p9), [#allocation4], %s2013_s7 }
  0x69   : > { %s3177_s14 = scalar_lea.vmem (!%p804_p9), [#allocation5], %s2014_s8  ;;  %p2016_p11 = scmp.ne.s32.totalorder (!%p804_p9), %s2779_s17, 0 }
  0x6e   : > { %s3516_s18 = smov (!%p848_p10, %s2783_s18), 1  ;;  %855 = sbr.rel (%p2016_p11) target bundleno = 120 (0x78), region = 119 }
  0x6f   : > { %s2015_s9 = sshll.u32 %s3516_s18, 3  ;;  %vm856_vm0 = vcmask (!%p2016_p11), 253952   ;;  %vm865_vm1 = vcmask (!%p2016_p11), 0   ;;  %v2797_v8 = vmov (!%p2016_p11), 0.0  }
  0x70   : > { %s3173_s12 = scalar_lea.vmem %s3501_s4, %s2015_s9  ;;  %857 = vst.msk [vmem:[#allocation2] sm:$0x1] (!%p2016_p11), %vm856_vm0, %v2797_v8  ;;  %858 = vst.msk [vmem:[#allocation2 + $0x1] sm:$0x1] (!%p2016_p11), %vm856_vm0, %v2797_v8 }
  0x71   : > { %859 = vst.msk [vmem:[#allocation2 + $0x2] sm:$0x1] (!%p2016_p11), %vm856_vm0, %v2797_v8  ;;  %860 = vst.msk [vmem:[#allocation2 + $0x3] sm:$0x1] (!%p2016_p11), %vm856_vm0, %v2797_v8 }
  0x72   : > { %861 = vst.msk [vmem:[#allocation2 + $0x4] sm:$0x1] (!%p2016_p11), %vm856_vm0, %v2797_v8  ;;  %862 = vst.msk [vmem:[#allocation2 + $0x5] sm:$0x1] (!%p2016_p11), %vm856_vm0, %v2797_v8 }
  0x73   : > { %863 = vst.msk [vmem:[#allocation2 + $0x6] sm:$0x1] (!%p2016_p11), %vm856_vm0, %v2797_v8  ;;  %864 = vst.msk [vmem:[#allocation2 + $0x7] sm:$0x1] (!%p2016_p11), %vm856_vm0, %v2797_v8 }
  0x74   : > { %866 = vst.msk [vmem:[#allocation3] sm:$0x1] (!%p2016_p11), %vm865_vm1, %v2797_v8  ;;  %867 = vst.msk [vmem:[#allocation3 + $0x1] sm:$0x1] (!%p2016_p11), %vm865_vm1, %v2797_v8 }
  0x75   : > { %868 = vst.msk [vmem:[#allocation3 + $0x2] sm:$0x1] %vm865_vm1, %v2797_v8  ;;  %869 = vst.msk [vmem:[#allocation3 + $0x3] sm:$0x1] %vm865_vm1, %v2797_v8 }
  0x76   : > { %870 = vst.msk [vmem:[#allocation3 + $0x4] sm:$0x1] %vm865_vm1, %v2797_v8  ;;  %871 = vst.msk [vmem:[#allocation3 + $0x5] sm:$0x1] %vm865_vm1, %v2797_v8 }
  0x77   : > { %872 = vst.msk [vmem:[#allocation3 + $0x6] sm:$0x1] %vm865_vm1, %v2797_v8  ;;  %873 = vst.msk [vmem:[#allocation3 + $0x7] sm:$0x1] %vm865_vm1, %v2797_v8 }
  0x78 PF: > { %v874_v9 = vld [vmem:[%s3175_s13] sm:$0xff]  ;;  %v875_v10 = vld [vmem:[%s3175_s13 + $0x8] sm:$0xff]  ;;  %v2798_v12 = vmov 0.0|0.0   ;;  %v876_v15 = vld [vmem:[%s3175_s13 + $0x10] sm:$0xff]  ;;  %vm2799_vm2 = vmmov 0   ;;  %v2800_v20 = vmov 0.0  }
  0x79   : > { %v890_v11 = vld [vmem:[%s3175_s13 + $0x80] sm:$0xff]  ;;  %2456 = vmatprep.subr.bf16.mxu0 %v2798_v12  ;;  %2480 = vmatprep.subr.bf16.mxu1 %v2798_v12  ;;  %v2457_v13 = vpack.c.bf16 %v875_v10, %v874_v9  ;;  %v891_v14 = vld [vmem:[%s3175_s13 + $0x88] sm:$0xff]  ;;  %v877_v16 = vld [vmem:[%s3175_s13 + $0x18] sm:$0xff]  ;;  %vm1603_vm3 = vcmask 1040384   ;;  %vm1636_vm4 = vcmask 0   ;;  %vm1586_vm5 = vcmask 253952  }
  0x7a   : > { %v2481_v17 = vpack.c.bf16 %v891_v14, %v890_v11  ;;  %v892_v18 = vld [vmem:[%s3175_s13 + $0x90] sm:$0xff]  ;;  %v893_v19 = vld [vmem:[%s3175_s13 + $0x98] sm:$0xff]  ;;  %2197 = vmatprep.mubr.msk.f32.mxu0 %vm2799_vm2, %v2800_v20  ;;  %2232 = vmatprep.mubr.msk.f32.mxu1 %vm2799_vm2, %v2800_v20  ;;  %v2460_v21 = vpack.c.bf16 %v877_v16, %v876_v15  ;;  %v878_v23 = vld [vmem:[%s3175_s13 + $0x20] sm:$0xff]  ;;  %p2017_p12 = scmp.ne.s32.totalorder %s2779_s17, 1 }
  0x7b   : > { %2458 = vmatpush3.bf16.msra.mxu0 %v2457_v13  ;;  %v2484_v22 = vpack.c.bf16 %v893_v19, %v892_v18  ;;  %v879_v24 = vld [vmem:[%s3175_s13 + $0x28] sm:$0xff]  ;;  %v894_v25 = vld [vmem:[%s3175_s13 + $0xa0] sm:$0xff]  ;;  %v880_v29 = vld [vmem:[%s3175_s13 + $0x30] sm:$0xff]  ;;  %vm2803_vm6 = vmmov (!%p2017_p12), 0   ;;  %vm1821_vm7 = vcmask (!%p2017_p12), 261120   ;;  %vm1894_vm8 = vcmask (!%p2017_p12), 23552  }
  0x7c   : > { %2482 = vmatpush3.bf16.msra.mxu1 %v2481_v17  ;;  %2459 = vmatprep.subr.bf16.mxu0 %v2798_v12  ;;  %v895_v26 = vld [vmem:[%s3175_s13 + $0xa8] sm:$0xff]  ;;  %v2463_v27 = vpack.c.bf16 %v879_v24, %v878_v23  ;;  %v881_v30 = vld [vmem:[%s3175_s13 + $0x38] sm:$0xff]  ;;  %v896_v31 = vld [vmem:[%s3175_s13 + $0xb0] sm:$0xff] }
  0x7d   : > { %2483 = vmatprep.subr.bf16.mxu1 %v2798_v12  ;;  %v2487_v28 = vpack.c.bf16 %v895_v26, %v894_v25  ;;  %v897_v32 = vld [vmem:[%s3175_s13 + $0xb8] sm:$0xff]  ;;  %v3215_v33 = vld [vmem:[%s3177_s14] sm:$0x1]  ;;  %v2466_v34 = vpack.c.bf16 %v881_v30, %v880_v29  ;;  %v1003_v41 = vld [vmem:[%s3177_s14 + $0x1] sm:$0x1] }
  0x7e   : > { %v1604_v35 = vsel %vm1603_vm3, %v3215_v33, 0.0  ;;  %v2490_v36 = vpack.c.bf16 %v897_v32, %v896_v31  ;;  %v882_v37 = vld [vmem:[%s3175_s13 + $0x40] sm:$0xff]  ;;  %v883_v38 = vld [vmem:[%s3175_s13 + $0x48] sm:$0xff]  ;;  %v1607_v42 = vsel %vm1603_vm3, %v1003_v41, 0.0  ;;  %v884_v45 = vld [vmem:[%s3175_s13 + $0x50] sm:$0xff] }
  0x7f   : > { %2461 = vmatpush3.bf16.msra.mxu0 %v2460_v21  ;;  %v898_v39 = vld [vmem:[%s3175_s13 + $0xc0] sm:$0xff]  ;;  %v899_v40 = vld [vmem:[%s3175_s13 + $0xc8] sm:$0xff]  ;;  %1605 = vadd.xlane.f32.xlu0 %v1604_v35  ;;  %v2469_v43 = vpack.c.bf16 %v883_v38, %v882_v37  ;;  %v885_v46 = vld [vmem:[%s3175_s13 + $0x58] sm:$0xff] }
  0x80   : > { %2485 = vmatpush3.bf16.msra.mxu1 %v2484_v22  ;;  %2462 = vmatprep.subr.bf16.mxu0 %v2798_v12  ;;  %v2493_v44 = vpack.c.bf16 %v899_v40, %v898_v39  ;;  %v900_v47 = vld [vmem:[%s3175_s13 + $0xd0] sm:$0xff]  ;;  %v901_v48 = vld [vmem:[%s3175_s13 + $0xd8] sm:$0xff]  ;;  %v2472_v49 = vpack.c.bf16 %v885_v46, %v884_v45  ;;  %v886_v51 = vld [vmem:[%s3175_s13 + $0x60] sm:$0xff] }
  0x81   : > { %2486 = vmatprep.subr.bf16.mxu1 %v2798_v12  ;;  %v2496_v50 = vpack.c.bf16 %v901_v48, %v900_v47  ;;  %v887_v52 = vld [vmem:[%s3175_s13 + $0x68] sm:$0xff]  ;;  %v902_v53 = vld [vmem:[%s3175_s13 + $0xe0] sm:$0xff]  ;;  %v888_v59 = vld [vmem:[%s3175_s13 + $0x70] sm:$0xff] }
  0x82   : > { %v903_v54 = vld [vmem:[%s3175_s13 + $0xe8] sm:$0xff]  ;;  %v2475_v56 = vpack.c.bf16 %v887_v52, %v886_v51  ;;  %v889_v60 = vld [vmem:[%s3175_s13 + $0x78] sm:$0xff]  ;;  %v904_v61 = vld [vmem:[%s3175_s13 + $0xf0] sm:$0xff] }
  0x83   : > { %2464 = vmatpush3.bf16.msra.mxu0 %v2463_v27  ;;  %1608 = vadd.xlane.f32.xlu0 %v1607_v42  ;;  %v3240_v55 = vld [vmem:[%s3177_s14 + $0x2] sm:$0x1]  ;;  %v2499_v58 = vpack.c.bf16 %v903_v54, %v902_v53  ;;  %v905_v62 = vld [vmem:[%s3175_s13 + $0xf8] sm:$0xff]  ;;  %v3251_v63 = vld [vmem:[%s3177_s14 + $0x3] sm:$0x1]  ;;  %v2478_v1 = vpack.c.bf16 %v889_v60, %v888_v59 }
  0x84   : > { %2488 = vmatpush3.bf16.msra.mxu1 %v2487_v28  ;;  %2465 = vmatprep.subr.bf16.mxu0 %v2798_v12  ;;  %v1610_v57 = vsel %vm1603_vm3, %v3240_v55, 0.0  ;;  %v1613_v0 = vsel %vm1603_vm3, %v3251_v63, 0.0  ;;  %v2502_v2 = vpack.c.bf16 %v905_v62, %v904_v61  ;;  %v906_v3 = vld [vmem:[%s3175_s13 + $0x100] sm:$0xff]  ;;  %v907_v4 = vld [vmem:[%s3175_s13 + $0x108] sm:$0xff]  ;;  %v908_v9 = vld [vmem:[%s3175_s13 + $0x110] sm:$0xff] }
  0x85   : > { %2489 = vmatprep.subr.bf16.mxu1 %v2798_v12  ;;  %1611 = vadd.xlane.f32.xlu1 %v1610_v57  ;;  %v922_v5 = vld [vmem:[%s3175_s13 + $0x180] sm:$0xff]  ;;  %v923_v6 = vld [vmem:[%s3175_s13 + $0x188] sm:$0xff]  ;;  %v2505_v7 = vpack.c.bf16 %v907_v4, %v906_v3  ;;  %v909_v10 = vld [vmem:[%s3175_s13 + $0x118] sm:$0xff] }
  0x86   : > { %v2529_v8 = vpack.c.bf16 %v923_v6, %v922_v5  ;;  %v924_v11 = vld [vmem:[%s3175_s13 + $0x190] sm:$0xff]  ;;  %v925_v13 = vld [vmem:[%s3175_s13 + $0x198] sm:$0xff]  ;;  %v3269_v14 = vld [vmem:[%s3177_s14 + $0x5] sm:$0x1]  ;;  %v2508_v15 = vpack.c.bf16 %v909_v10, %v908_v9 }
  0x87   : > { %2467 = vmatpush3.bf16.msra.mxu0 %v2466_v34  ;;  %v3272_v16 = vld [vmem:[%s3177_s14 + $0x4] sm:$0x1]  ;;  %v1619_v17 = vsel %vm1603_vm3, %v3269_v14, 0.0  ;;  %v2532_v18 = vpack.c.bf16 %v925_v13, %v924_v11  ;;  %v912_v27 = vld [vmem:[%s3175_s13 + $0x130] sm:$0xff]  ;;  %v913_v28 = vld [vmem:[%s3175_s13 + $0x138] sm:$0xff] }
  0x88   : > { %2491 = vmatpush3.bf16.msra.mxu1 %v2490_v36  ;;  %2468 = vmatprep.subr.bf16.mxu0 %v2798_v12  ;;  %v910_v19 = vld [vmem:[%s3175_s13 + $0x120] sm:$0xff]  ;;  %v911_v21 = vld [vmem:[%s3175_s13 + $0x128] sm:$0xff]  ;;  %v1616_v22 = vsel %vm1603_vm3, %v3272_v16, 0.0  ;;  %v928_v29 = vld [vmem:[%s3175_s13 + $0x1b0] sm:$0xff]  ;;  %v2514_v31 = vpack.c.bf16 %v913_v28, %v912_v27 }
  0x89   : > { %2492 = vmatprep.subr.bf16.mxu1 %v2798_v12  ;;  %1614 = vadd.xlane.f32.xlu1 %v1613_v0  ;;  %v926_v23 = vld [vmem:[%s3175_s13 + $0x1a0] sm:$0xff]  ;;  %v927_v24 = vld [vmem:[%s3175_s13 + $0x1a8] sm:$0xff]  ;;  %v2511_v25 = vpack.c.bf16 %v911_v21, %v910_v19  ;;  %v929_v30 = vld [vmem:[%s3175_s13 + $0x1b8] sm:$0xff] }
  0x8a   : > { %1617 = vadd.xlane.f32.xlu0 %v1616_v22  ;;  %v2535_v26 = vpack.c.bf16 %v927_v24, %v926_v23  ;;  %v2538_v32 = vpack.c.bf16 %v929_v30, %v928_v29  ;;  %v915_v34 = vld [vmem:[%s3175_s13 + $0x148] sm:$0xff]  ;;  %v930_v36 = vld [vmem:[%s3175_s13 + $0x1c0] sm:$0xff]  ;;  %v932_v45 = vld [vmem:[%s3175_s13 + $0x1d0] sm:$0xff] }
  0x8b   : > { %2470 = vmatpush3.bf16.msra.mxu0 %v2469_v43  ;;  %v3298_v35 = vld [vmem:[%s3177_s14 + $0x6] sm:$0x1]  ;;  %v3304_v38 = vld [vmem:[%s3177_s14 + $0x7] sm:$0x1]  ;;  %v916_v43 = vld [vmem:[%s3175_s13 + $0x150] sm:$0xff] }
  0x8c   : > { %2494 = vmatpush3.bf16.msra.mxu1 %v2493_v44  ;;  %2471 = vmatprep.subr.bf16.mxu0 %v2798_v12  ;;  %v931_v37 = vld [vmem:[%s3175_s13 + $0x1c8] sm:$0xff]  ;;  %v1622_v39 = vsel %vm1603_vm3, %v3298_v35, 0.0  ;;  %v1625_v40 = vsel %vm1603_vm3, %v3304_v38, 0.0  ;;  %v917_v44 = vld [vmem:[%s3175_s13 + $0x158] sm:$0xff]  ;;  %v934_v51 = vld [vmem:[%s3175_s13 + $0x1e0] sm:$0xff] }
  0x8d   : > { %2495 = vmatprep.subr.bf16.mxu1 %v2798_v12  ;;  %1620 = vadd.xlane.f32.xlu1 %v1619_v17  ;;  %v2541_v42 = vpack.c.bf16 %v931_v37, %v930_v36  ;;  %v933_v46 = vld [vmem:[%s3175_s13 + $0x1d8] sm:$0xff]  ;;  %v2520_v47 = vpack.c.bf16 %v917_v44, %v916_v43  ;;  %v935_v52 = vld [vmem:[%s3175_s13 + $0x1e8] sm:$0xff]  ;;  %v938_v62 = vld [vmem:[%s3175_s13 + $0x200] sm:$0xff] }
  0x8e   : > { %1623 = vadd.xlane.f32.xlu0 %v1622_v39  ;;  %v2544_v48 = vpack.c.bf16 %v933_v46, %v932_v45  ;;  %v2547_v54 = vpack.c.bf16 %v935_v52, %v934_v51  ;;  %v921_v57 = vld [vmem:[%s3175_s13 + $0x178] sm:$0xff]  ;;  %v939_v0 = vld [vmem:[%s3175_s13 + $0x208] sm:$0xff]  ;;  %v940_v5 = vld [vmem:[%s3175_s13 + $0x210] sm:$0xff] }
  0x8f   : > { %2473 = vmatpush3.bf16.msra.mxu0 %v2472_v49  ;;  %v918_v49 = vld [vmem:[%s3175_s13 + $0x160] sm:$0xff]  ;;  %v937_v59 = vld [vmem:[%s3175_s13 + $0x1f8] sm:$0xff]  ;;  %v2553_v3 = vpack.c.bf16 %v939_v0, %v938_v62  ;;  %v943_v13 = vld [vmem:[%s3175_s13 + $0x228] sm:$0xff] }
  0x90   : > { %2497 = vmatpush3.bf16.msra.mxu1 %v2496_v50  ;;  %2474 = vmatprep.subr.bf16.mxu0 %v2798_v12  ;;  %v919_v50 = vld [vmem:[%s3175_s13 + $0x168] sm:$0xff]  ;;  %v941_v6 = vld [vmem:[%s3175_s13 + $0x218] sm:$0xff]  ;;  %v942_v11 = vld [vmem:[%s3175_s13 + $0x220] sm:$0xff] }
  0x91   : > { %2498 = vmatprep.subr.bf16.mxu1 %v2798_v12  ;;  %1626 = vadd.xlane.f32.xlu1 %v1625_v40  ;;  %v2523_v53 = vpack.c.bf16 %v919_v50, %v918_v49  ;;  %v2556_v9 = vpack.c.bf16 %v941_v6, %v940_v5  ;;  %v959_v17 = vld [vmem:[%s3175_s13 + $0x2a8] sm:$0xff]  ;;  %v945_v19 = vld [vmem:[%s3175_s13 + $0x238] sm:$0xff]  ;;  %v960_v21 = vld [vmem:[%s3175_s13 + $0x2b0] sm:$0xff] }
  0x92   : > { %v961_v22 = vld [vmem:[%s3175_s13 + $0x2b8] sm:$0xff]  ;;  %v962_v27 = vld [vmem:[%s3175_s13 + $0x2c0] sm:$0xff]  ;;  %v963_v28 = vld [vmem:[%s3175_s13 + $0x2c8] sm:$0xff] }
  0x93   : > { %2476 = vmatpush3.bf16.msra.mxu0 %v2475_v56  ;;  %v920_v56 = vld [vmem:[%s3175_s13 + $0x170] sm:$0xff]  ;;  %v2586_v24 = vpack.c.bf16 %v961_v22, %v960_v21  ;;  %v2589_v30 = vpack.c.bf16 %v963_v28, %v962_v27  ;;  %v950_v39 = vld [vmem:[%s3175_s13 + $0x260] sm:$0xff]  ;;  %v951_v40 = vld [vmem:[%s3175_s13 + $0x268] sm:$0xff] }
  0x94   : > { %2500 = vmatpush3.bf16.msra.mxu1 %v2499_v58  ;;  %2477 = vmatprep.subr.bf16.mxu0 %v2798_v12  ;;  %v936_v58 = vld [vmem:[%s3175_s13 + $0x1f0] sm:$0xff]  ;;  %v2526_v60 = vpack.c.bf16 %v921_v57, %v920_v56  ;;  %v2571_v43 = vpack.c.bf16 %v951_v40, %v950_v39  ;;  %v953_v46 = vld [vmem:[%s3175_s13 + $0x278] sm:$0xff]  ;;  %v970_v51 = vld [vmem:[%s3175_s13 + $0x300] sm:$0xff] }
  0x95   : > { %2501 = vmatprep.subr.bf16.mxu1 %v2798_v12  ;;  %v2550_v61 = vpack.c.bf16 %v937_v59, %v936_v58  ;;  %v952_v45 = vld [vmem:[%s3175_s13 + $0x270] sm:$0xff]  ;;  %v971_v52 = vld [vmem:[%s3175_s13 + $0x308] sm:$0xff]  ;;  %v973_v59 = vld [vmem:[%s3175_s13 + $0x318] sm:$0xff] }
  0x96   : > { %v2574_v49 = vpack.c.bf16 %v953_v46, %v952_v45  ;;  %v2601_v56 = vpack.c.bf16 %v971_v52, %v970_v51  ;;  %v972_v58 = vld [vmem:[%s3175_s13 + $0x310] sm:$0xff]  ;;  %v977_v6 = vld [vmem:[%s3175_s13 + $0x338] sm:$0xff]  ;;  %v999_v27 = vld [vmem:[%s3175_s13 + $0x3e8] sm:$0xff] }
  0x97   : > { %2479 = vmatpush3.bf16.msra.mxu0 %v2478_v1  ;;  %v954_v1 = vld [vmem:[%s3175_s13 + $0x280] sm:$0xff]  ;;  %v2604_v62 = vpack.c.bf16 %v973_v59, %v972_v58  ;;  %v976_v5 = vld [vmem:[%s3175_s13 + $0x330] sm:$0xff]  ;;  %v997_v21 = vld [vmem:[%s3175_s13 + $0x3d8] sm:$0xff] }
  0x98   : > { %2503 = vmatpush3.bf16.msra.mxu1 %v2502_v2  ;;  %2504 = vmatprep.subr.bf16.mxu0 %v2798_v12  ;;  %v955_v2 = vld [vmem:[%s3175_s13 + $0x288] sm:$0xff]  ;;  %v1595_v40 = vld [vmem:[#allocation3] sm:$0x1]  ;;  %v1596_v45 = vld [vmem:[#allocation3 + $0x1] sm:$0x1] }
  0x99   : > { %2528 = vmatprep.subr.bf16.mxu1 %v2798_v12  ;;  %v2577_v4 = vpack.c.bf16 %v955_v2, %v954_v1  ;;  %v974_v1 = vld [vmem:[%s3175_s13 + $0x320] sm:$0xff]  ;;  %v975_v2 = vld [vmem:[%s3175_s13 + $0x328] sm:$0xff] }
  0x9a   : > { %2198 = vmatmul.mubr.f32.vlgmr.msra.gmra.mrb[0].mxu0 %v3215_v33  ;;  %v914_v33 = vld [vmem:[%s3175_s13 + $0x140] sm:$0xff] }
  0x9b   : > { %2233 = vmatmul.mubr.f32.vlgmr.msra.gmra.mrb[0].mxu1 %v1003_v41  ;;  %2506 = vmatpush3.bf16.msra.mxu0 %v2505_v7  ;;  %v2517_v41 = vpack.c.bf16 %v915_v34, %v914_v33  ;;  %v956_v7 = vld [vmem:[%s3175_s13 + $0x290] sm:$0xff]  ;;  %v965_v34 = vld [vmem:[%s3175_s13 + $0x2d8] sm:$0xff] }
  0x9c   : > { %2530 = vmatpush3.bf16.msra.mxu1 %v2529_v8  ;;  %2507 = vmatprep.subr.bf16.mxu0 %v2798_v12  ;;  %v957_v8 = vld [vmem:[%s3175_s13 + $0x298] sm:$0xff]  ;;  %v964_v33 = vld [vmem:[%s3175_s13 + $0x2d0] sm:$0xff] }
  0x9d   : > { %2531 = vmatprep.subr.bf16.mxu1 %v2798_v12  ;;  %2267 = vmatprep.mubr.msk.f32.mxu0 %vm2799_vm2, %v2800_v20  ;;  %v2580_v10 = vpack.c.bf16 %v957_v8, %v956_v7  ;;  %v2592_v37 = vpack.c.bf16 %v965_v34, %v964_v33  ;;  %v992_v7 = vld [vmem:[%s3175_s13 + $0x3b0] sm:$0xff]  ;;  %v993_v8 = vld [vmem:[%s3175_s13 + $0x3b8] sm:$0xff] }
  0x9e   : > { %2302 = vmatprep.mubr.msk.f32.mxu1 %vm2799_vm2, %v2800_v20  ;;  %v1001_v33 = vld [vmem:[%s3175_s13 + $0x3f8] sm:$0xff] }
  0x9f   : > { %2509 = vmatpush3.bf16.msra.mxu0 %v2508_v15  ;;  %v958_v15 = vld [vmem:[%s3175_s13 + $0x2a0] sm:$0xff] }
  0xa0   : > { %2533 = vmatpush3.bf16.msra.mxu1 %v2532_v18  ;;  %2510 = vmatprep.subr.bf16.mxu0 %v2798_v12  ;;  %v944_v18 = vld [vmem:[%s3175_s13 + $0x230] sm:$0xff] }
  0xa1   : > { %2534 = vmatprep.subr.bf16.mxu1 %v2798_v12  ;;  %v2562_v23 = vpack.c.bf16 %v945_v19, %v944_v18  ;;  %v981_v18 = vld [vmem:[%s3175_s13 + $0x358] sm:$0xff]  ;;  %v996_v19 = vld [vmem:[%s3175_s13 + $0x3d0] sm:$0xff] }
  0xa3   : > { %2512 = vmatpush3.bf16.msra.mxu0 %v2511_v25  ;;  %v946_v25 = vld [vmem:[%s3175_s13 + $0x240] sm:$0xff] }
  0xa4   : > { %2536 = vmatpush3.bf16.msra.mxu1 %v2535_v26  ;;  %2513 = vmatprep.subr.bf16.mxu0 %v2798_v12  ;;  %v947_v26 = vld [vmem:[%s3175_s13 + $0x248] sm:$0xff] }
  0xa5   : > { %2537 = vmatprep.subr.bf16.mxu1 %v2798_v12  ;;  %v2565_v29 = vpack.c.bf16 %v947_v26, %v946_v25  ;;  %v983_v25 = vld [vmem:[%s3175_s13 + $0x368] sm:$0xff]  ;;  %v998_v26 = vld [vmem:[%s3175_s13 + $0x3e0] sm:$0xff] }
  0xa7   : > { %2515 = vmatpush3.bf16.msra.mxu0 %v2514_v31  ;;  %v948_v31 = vld [vmem:[%s3175_s13 + $0x250] sm:$0xff] }
  0xa8   : > { %2539 = vmatpush3.bf16.msra.mxu1 %v2538_v32  ;;  %2516 = vmatprep.subr.bf16.mxu0 %v2798_v12  ;;  %v949_v32 = vld [vmem:[%s3175_s13 + $0x258] sm:$0xff] }
  0xa9   : > { %2540 = vmatprep.subr.bf16.mxu1 %v2798_v12  ;;  %v2568_v36 = vpack.c.bf16 %v949_v32, %v948_v31  ;;  %v985_v31 = vld [vmem:[%s3175_s13 + $0x378] sm:$0xff]  ;;  %v1000_v32 = vld [vmem:[%s3175_s13 + $0x3f0] sm:$0xff] }
  0xab   : > { %2518 = vmatpush3.bf16.msra.mxu0 %v2517_v41  ;;  %v966_v41 = vld [vmem:[%s3175_s13 + $0x2e0] sm:$0xff] }
  0xac   : > { %2542 = vmatpush3.bf16.msra.mxu1 %v2541_v42  ;;  %2519 = vmatprep.subr.bf16.mxu0 %v2798_v12  ;;  %v967_v42 = vld [vmem:[%s3175_s13 + $0x2e8] sm:$0xff] }
  0xad   : > { %2543 = vmatprep.subr.bf16.mxu1 %v2798_v12  ;;  %v2595_v44 = vpack.c.bf16 %v967_v42, %v966_v41 }
  0xaf   : > { %2521 = vmatpush3.bf16.msra.mxu0 %v2520_v47  ;;  %v968_v47 = vld [vmem:[%s3175_s13 + $0x2f0] sm:$0xff] }
  0xb0   : > { %2545 = vmatpush3.bf16.msra.mxu1 %v2544_v48  ;;  %2522 = vmatprep.subr.bf16.mxu0 %v2798_v12  ;;  %v969_v48 = vld [vmem:[%s3175_s13 + $0x2f8] sm:$0xff] }
  0xb1   : > { %2546 = vmatprep.subr.bf16.mxu1 %v2798_v12  ;;  %v2598_v50 = vpack.c.bf16 %v969_v48, %v968_v47 }
  0xb3   : > { %2524 = vmatpush3.bf16.msra.mxu0 %v2523_v53  ;;  %v986_v53 = vld [vmem:[%s3175_s13 + $0x380] sm:$0xff] }
  0xb4   : > { %2548 = vmatpush3.bf16.msra.mxu1 %v2547_v54  ;;  %2525 = vmatprep.subr.bf16.mxu0 %v2798_v12  ;;  %v987_v54 = vld [vmem:[%s3175_s13 + $0x388] sm:$0xff] }
  0xb5   : > { %2549 = vmatprep.subr.bf16.mxu1 %v2798_v12  ;;  %v2625_v57 = vpack.c.bf16 %v987_v54, %v986_v53  ;;  %v1602_v53 = vld [vmem:[#allocation3 + $0x7] sm:$0x1]  ;;  %v1601_v54 = vld [vmem:[#allocation3 + $0x6] sm:$0x1] }
  0xb7   : > { %2527 = vmatpush3.bf16.msra.mxu0 %v2526_v60  ;;  %v988_v60 = vld [vmem:[%s3175_s13 + $0x390] sm:$0xff] }
  0xb8   : > { %2551 = vmatpush3.bf16.msra.mxu1 %v2550_v61  ;;  %2552 = vmatprep.subr.bf16.mxu0 %v2798_v12  ;;  %v989_v61 = vld [vmem:[%s3175_s13 + $0x398] sm:$0xff] }
  0xb9   : > { %2576 = vmatprep.subr.bf16.mxu1 %v2798_v12  ;;  %v2628_v0 = vpack.c.bf16 %v989_v61, %v988_v60  ;;  %v1010_v60 = vld [vmem:[#allocation2] sm:$0x1]  ;;  %v1011_v61 = vld [vmem:[#allocation2 + $0x1] sm:$0x1] }
  0xba   : > { %2268 = vmatmul.mubr.f32.vlgmr.msra.gmra.mrb[2].mxu0 %v3240_v55  ;;  %v2559_v55 = vpack.c.bf16 %v943_v13, %v942_v11  ;;  %v979_v11 = vld [vmem:[%s3175_s13 + $0x348] sm:$0xff]  ;;  %v994_v13 = vld [vmem:[%s3175_s13 + $0x3c0] sm:$0xff] }
  0xbb   : > { %2303 = vmatmul.mubr.f32.vlgmr.msra.gmra.mrb[2].mxu1 %v3251_v63  ;;  %2554 = vmatpush3.bf16.msra.mxu0 %v2553_v3  ;;  %v2583_v63 = vpack.c.bf16 %v959_v17, %v958_v15  ;;  %v990_v3 = vld [vmem:[%s3175_s13 + $0x3a0] sm:$0xff]  ;;  %v995_v15 = vld [vmem:[%s3175_s13 + $0x3c8] sm:$0xff] }
  0xbc   : > { %2578 = vmatpush3.bf16.msra.mxu1 %v2577_v4  ;;  %2555 = vmatprep.subr.bf16.mxu0 %v2798_v12  ;;  %v991_v4 = vld [vmem:[%s3175_s13 + $0x3a8] sm:$0xff] }
  0xbd   : > { %2579 = vmatprep.subr.bf16.mxu1 %v2798_v12  ;;  %2337 = vmatprep.mubr.msk.f32.mxu0 %vm2799_vm2, %v2800_v20 }
  0xbe   : > { %2372 = vmatprep.mubr.msk.f32.mxu1 %vm2799_vm2, %v2800_v20 }
  0xbf   : > { %2557 = vmatpush3.bf16.msra.mxu0 %v2556_v9  ;;  %v2634_v9 = vpack.c.bf16 %v993_v8, %v992_v7 }
  0xc0   : > { %2581 = vmatpush3.bf16.msra.mxu1 %v2580_v10  ;;  %2558 = vmatprep.subr.bf16.mxu0 %v2798_v12  ;;  %v978_v10 = vld [vmem:[%s3175_s13 + $0x340] sm:$0xff] }
  0xc1   : > { %2582 = vmatprep.subr.bf16.mxu1 %v2798_v12  ;;  %v2613_v17 = vpack.c.bf16 %v979_v11, %v978_v10  ;;  %v1014_v10 = vld [vmem:[#allocation2 + $0x4] sm:$0x1]  ;;  %v1015_v11 = vld [vmem:[#allocation2 + $0x5] sm:$0x1] }
  0xc3   : > { %2560 = vmatpush3.bf16.msra.mxu0 %v2559_v55  ;;  %v2637_v55 = vpack.c.bf16 %v995_v15, %v994_v13 }
  0xc4   : > { %2584 = vmatpush3.bf16.msra.mxu1 %v2583_v63  ;;  %2561 = vmatprep.subr.bf16.mxu0 %v2798_v12  ;;  %v980_v63 = vld [vmem:[%s3175_s13 + $0x350] sm:$0xff] }
  0xc5   : > { %2585 = vmatprep.subr.bf16.mxu1 %v2798_v12  ;;  %v2616_v22 = vpack.c.bf16 %v981_v18, %v980_v63 }
  0xc7   : > { %2563 = vmatpush3.bf16.msra.mxu0 %v2562_v23  ;;  %v2640_v23 = vpack.c.bf16 %v997_v21, %v996_v19  ;;  %v1016_v19 = vld [vmem:[#allocation2 + $0x6] sm:$0x1]  ;;  %v1017_v21 = vld [vmem:[#allocation2 + $0x7] sm:$0x1] }
  0xc8   : > { %2587 = vmatpush3.bf16.msra.mxu1 %v2586_v24  ;;  %2564 = vmatprep.subr.bf16.mxu0 %v2798_v12  ;;  %v982_v24 = vld [vmem:[%s3175_s13 + $0x360] sm:$0xff] }
  0xc9   : > { %2588 = vmatprep.subr.bf16.mxu1 %v2798_v12  ;;  %v2619_v28 = vpack.c.bf16 %v983_v25, %v982_v24 }
  0xcb   : > { %2566 = vmatpush3.bf16.msra.mxu0 %v2565_v29  ;;  %v2643_v29 = vpack.c.bf16 %v999_v27, %v998_v26 }
  0xcc   : > { %2590 = vmatpush3.bf16.msra.mxu1 %v2589_v30  ;;  %2567 = vmatprep.subr.bf16.mxu0 %v2798_v12  ;;  %v984_v30 = vld [vmem:[%s3175_s13 + $0x370] sm:$0xff] }
  0xcd   : > { %2591 = vmatprep.subr.bf16.mxu1 %v2798_v12  ;;  %v2622_v34 = vpack.c.bf16 %v985_v31, %v984_v30  ;;  %v2801_v30 = vmov (!%p2017_p12), 0  }
  0xce   : > { %2720 = vset.pattern.permute.xlu1 (!%p2017_p12), %v2801_v30  ;;  %2719 = vset.pattern.permute.xlu0 (!%p2017_p12), %v2801_v30 }
  0xcf   : > { %2569 = vmatpush3.bf16.msra.mxu0 %v2568_v36  ;;  %v2646_v36 = vpack.c.bf16 %v1001_v33, %v1000_v32 }
  0xd0   : > { %2593 = vmatpush3.bf16.msra.mxu1 %v2592_v37  ;;  %2570 = vmatprep.subr.bf16.mxu0 %v2798_v12  ;;  %v1597_v37 = vld [vmem:[#allocation3 + $0x2] sm:$0x1] }
  0xd1   : > { %2594 = vmatprep.subr.bf16.mxu1 %v2798_v12 }
  0xd3   : > { %2572 = vmatpush3.bf16.msra.mxu0 %v2571_v43 }
  0xd4   : > { %2596 = vmatpush3.bf16.msra.mxu1 %v2595_v44  ;;  %2573 = vmatprep.subr.bf16.mxu0 %v2798_v12  ;;  %v1598_v44 = vld [vmem:[#allocation3 + $0x3] sm:$0x1] }
  0xd5   : > { %2597 = vmatprep.subr.bf16.mxu1 %v2798_v12 }
  0xd7   : > { %2575 = vmatpush3.bf16.msra.mxu0 %v2574_v49  ;;  %v1599_v49 = vld [vmem:[#allocation3 + $0x4] sm:$0x1] }
  0xd8   : > { %2599 = vmatpush3.bf16.msra.mxu1 %v2598_v50  ;;  %2600 = vmatprep.subr.bf16.mxu0 %v2798_v12 }
  0xd9   : > { %2624 = vmatprep.subr.bf16.mxu1 %v2798_v12 }
  0xda   : > { %2338 = vmatmul.mubr.f32.vlgmr.msra.gmra.mrb[4].mxu0 %v3272_v16  ;;  %v2631_v16 = vpack.c.bf16 %v991_v4, %v990_v3 }
  0xdb   : > { %2373 = vmatmul.mubr.f32.vlgmr.msra.gmra.mrb[4].mxu1 %v3269_v14  ;;  %2602 = vmatpush3.bf16.msra.mxu0 %v2601_v56  ;;  %v2607_v14 = vpack.c.bf16 %v975_v2, %v974_v1 }
  0xdc   : > { %2626 = vmatpush3.bf16.msra.mxu1 %v2625_v57  ;;  %2603 = vmatprep.subr.bf16.mxu0 %v2798_v12 }
  0xdd   : > { %2627 = vmatprep.subr.bf16.mxu1 %v2798_v12  ;;  %2407 = vmatprep.mubr.msk.f32.mxu0 %vm2799_vm2, %v2800_v20 }
  0xde   : > { %2442 = vmatprep.mubr.msk.f32.mxu1 %vm2799_vm2, %v2800_v20  ;;  %v2610_v20 = vpack.c.bf16 %v977_v6, %v976_v5 }
  0xdf   : > { %2605 = vmatpush3.bf16.msra.mxu0 %v2604_v62 }
  0xe0   : > { %2629 = vmatpush3.bf16.msra.mxu1 %v2628_v0  ;;  %2606 = vmatprep.subr.bf16.mxu0 %v2798_v12 }
  0xe1   : > { %2630 = vmatprep.subr.bf16.mxu1 %v2798_v12 }
  0xe3   : > { %2608 = vmatpush3.bf16.msra.mxu0 %v2607_v14  ;;  %v1012_v14 = vld [vmem:[#allocation2 + $0x2] sm:$0x1] }
  0xe4   : > { %2632 = vmatpush3.bf16.msra.mxu1 %v2631_v16  ;;  %2609 = vmatprep.subr.bf16.mxu0 %v2798_v12  ;;  %v1013_v16 = vld [vmem:[#allocation2 + $0x3] sm:$0x1] }
  0xe5   : > { %2633 = vmatprep.subr.bf16.mxu1 %v2798_v12 }
  0xe7   : > { %2611 = vmatpush3.bf16.msra.mxu0 %v2610_v20 }
  0xe8   : > { %2635 = vmatpush3.bf16.msra.mxu1 %v2634_v9  ;;  %2612 = vmatprep.subr.bf16.mxu0 %v2798_v12 }
  0xe9   : > { %2636 = vmatprep.subr.bf16.mxu1 %v2798_v12 }
  0xeb   : > { %2614 = vmatpush3.bf16.msra.mxu0 %v2613_v17 }
  0xec   : > { %2638 = vmatpush3.bf16.msra.mxu1 %v2637_v55  ;;  %2615 = vmatprep.subr.bf16.mxu0 %v2798_v12 }
  0xed   : > { %2639 = vmatprep.subr.bf16.mxu1 %v2798_v12 }
  0xef   : > { %2617 = vmatpush3.bf16.msra.mxu0 %v2616_v22 }
  0xf0   : > { %2641 = vmatpush3.bf16.msra.mxu1 %v2640_v23  ;;  %2618 = vmatprep.subr.bf16.mxu0 %v2798_v12 }
  0xf1   : > { %2642 = vmatprep.subr.bf16.mxu1 %v2798_v12 }
  0xf3   : > { %2620 = vmatpush3.bf16.msra.mxu0 %v2619_v28 }
  0xf4   : > { %2644 = vmatpush3.bf16.msra.mxu1 %v2643_v29  ;;  %2621 = vmatprep.subr.bf16.mxu0 %v2798_v12 }
  0xf5   : > { %2645 = vmatprep.subr.bf16.mxu1 %v2798_v12 }
  0xf7   : > { %2623 = vmatpush3.bf16.msra.mxu0 %v2622_v34 }
  0xf8   : > { %2647 = vmatpush3.bf16.msra.mxu1 %v2646_v36 }
  0xfa   : > { %2408 = vmatmul.mubr.f32.vlgmr.msra.gmra.mrb[6].mxu0 %v3298_v35  ;;  %v1600_v35 = vld [vmem:[#allocation3 + $0x5] sm:$0x1] }
  0xfb   : > { %2443 = vmatmul.mubr.f32.vlgmr.msra.gmra.mrb[6].mxu1 %v3304_v38 }
 0x10c   : > { %v1606_v41 = vpop.xlane.xlu0 %1605 }
 0x10d   : > { %v1628_v43 = vadd.f32 %v1606_v41, %v1595_v40  ;;  %v1754_v40 = vld [vmem:[%s3499_s2 + $0x8] sm:$0xff] (!%p2017_p12)  ;;  %v1755_v41 = vld [vmem:[%s3499_s2 + $0x10] sm:$0xff] (!%p2017_p12) }
 0x10f   : > { %1637 = vst.msk [vmem:[#allocation3] sm:$0x1] %vm1636_vm4, %v1628_v43 }
 0x110   : > { %v1609_v46 = vpop.xlane.xlu0 %1608 }
 0x111   : > { %v1629_v48 = vadd.f32 %v1609_v46, %v1596_v45  ;;  %v2804_v45 = vmov (!%p2017_p12), 0.0   ;;  %v1670_v46 = vlaneseq (!%p2017_p12) }
 0x112   : > { %v1612_v39 = vpop.xlane.xlu1 %1611  ;;  %2453 = vmatprep.mubr.msk.f32.mxu0 (!%p2017_p12), %vm2803_vm6, %v2804_v45 }
 0x113   : > { %v1630_v42 = vadd.f32 %v1612_v39, %v1597_v37  ;;  %1638 = vst.msk [vmem:[#allocation3 + $0x1] sm:$0x1] %vm1636_vm4, %v1629_v48  ;;  %v1753_v39 = vld [vmem:[%s3499_s2] sm:$0xff] (!%p2017_p12) }
 0x114   : > { %v2649_v43 = vpack.c.bf16 (!%p2017_p12), %v1754_v40, %v1753_v39 }
 0x115   : > { %1639 = vst.msk [vmem:[#allocation3 + $0x2] sm:$0x1] %vm1636_vm4, %v1630_v42  ;;  %v2802_v42 = vmov (!%p2017_p12), 0.0|0.0  }
 0x116   : > { %v1615_v12 = vpop.xlane.xlu1 %1614  ;;  %v1657_v29 = vld [vmem:[#allocation3] sm:$0x1] (!%p2017_p12)  ;;  %2648 = vmatprep.subr.bf16.mxu0 (!%p2017_p12), %v2802_v42 }
 0x117   : > { %v1631_v47 = vadd.f32 %v1615_v12, %v1598_v44  ;;  %v1618_v50 = vpop.xlane.xlu0 %1617  ;;  %1667 = vperm.xlu0 (!%p2017_p12), %2719, %v1657_v29   ;;  %v1756_v44 = vld [vmem:[%s3499_s2 + $0x18] sm:$0xff] (!%p2017_p12)  ;;  %2650 = vmatpush3.bf16.msra.mxu0 (!%p2017_p12), %v2649_v43  ;;  %v2018_v43 = vld [vmem:[%s3500_s3] ss:$0 sm:$0xff] (!%p2017_p12) }
 0x118   : > { %v1632_v52 = vadd.f32 %v1618_v50, %v1599_v49  ;;  %v2652_v12 = vpack.c.bf16 (!%p2017_p12), %v1756_v44, %v1755_v41  ;;  %2651 = vmatprep.subr.bf16.mxu0 (!%p2017_p12), %v2802_v42 }
 0x119   : > { %1640 = vst.msk [vmem:[#allocation3 + $0x3] sm:$0x1] %vm1636_vm4, %v1631_v47  ;;  %v1671_v47 = vshrl.u32 (!%p2017_p12), %v1670_v46, 7 }
 0x11a   : > { %v1621_v38 = vpop.xlane.xlu1 %1620  ;;  %1641 = vst.msk [vmem:[#allocation3 + $0x4] sm:$0x1] %vm1636_vm4, %v1632_v52  ;;  %v1658_v32 = vld [vmem:[#allocation3 + $0x1] sm:$0x1] (!%p2017_p12) }
 0x11b   : > { %v1633_v51 = vadd.f32 %v1621_v38, %v1600_v35  ;;  %v1624_v57 = vpop.xlane.xlu0 %1623  ;;  %1676 = vperm.xlu0 (!%p2017_p12), %2719, %v1658_v32   ;;  %2653 = vmatpush3.bf16.msra.mxu0 (!%p2017_p12), %v2652_v12  ;;  %v1672_v48 = vsub.s32 (!%p2017_p12), 0, %v1671_v47 }
 0x11c   : > { %v1634_v59 = vadd.f32 %v1624_v57, %v1601_v54  ;;  %v1659_v28 = vld [vmem:[#allocation3 + $0x2] sm:$0x1] (!%p2017_p12) }
 0x11d   : > { %1642 = vst.msk [vmem:[#allocation3 + $0x5] sm:$0x1] %vm1636_vm4, %v1633_v51  ;;  %1685 = vperm.xlu1 (!%p2017_p12), %2720, %v1659_v28  }
 0x11e   : > { %v1627_v56 = vpop.xlane.xlu1 %1626  ;;  %1643 = vst.msk [vmem:[#allocation3 + $0x6] sm:$0x1] %vm1636_vm4, %v1634_v59 }
 0x11f   : > { %v1635_v58 = vadd.f32 %v1627_v56, %v1602_v53 }
 0x120   : > { %v1660_v31 = vld [vmem:[#allocation3 + $0x3] sm:$0x1] (!%p2017_p12) }
 0x121   : > { %1644 = vst.msk [vmem:[#allocation3 + $0x7] sm:$0x1] %vm1636_vm4, %v1635_v58  ;;  %1694 = vperm.xlu1 (!%p2017_p12), %2720, %v1660_v31   ;;  %v1661_v34 = vld [vmem:[#allocation3 + $0x4] sm:$0x1] (!%p2017_p12) }
 0x122   : > { %1703 = vperm.xlu0 (!%p2017_p12), %2719, %v1661_v34  }
 0x124   : > { %v1662_v33 = vld [vmem:[#allocation3 + $0x5] sm:$0x1] (!%p2017_p12) }
 0x125   : > { %1712 = vperm.xlu1 (!%p2017_p12), %2720, %v1662_v33   ;;  %v1663_v37 = vld [vmem:[#allocation3 + $0x6] sm:$0x1] (!%p2017_p12) }
 0x126   : > { %1721 = vperm.xlu0 (!%p2017_p12), %2719, %v1663_v37  }
 0x128   : > { %v1664_v36 = vld [vmem:[#allocation3 + $0x7] sm:$0x1] (!%p2017_p12) }
 0x129   : > { %1730 = vperm.xlu1 (!%p2017_p12), %2720, %v1664_v36  }
 0x16d   : > { %v1084_v62 = vpop.f32.mrb[0].mxu0 }
 0x16e   : > { %v1578_v0 = vadd.f32 %v1084_v62, %v1010_v60  ;;  %v1154_v1 = vpop.f32.mrb[0].mxu1  ;;  %v2199_v2 = vpop.f32.mrb[1].mxu0 }
 0x16f   : > { %v1579_v3 = vadd.f32 %v1154_v1, %v1011_v61  ;;  %v2234_v4 = vpop.f32.mrb[1].mxu1  ;;  %v2805_v1 = vmov (!%p2017_p12), 1966171168  }
 0x170   : > { %1587 = vst.msk [vmem:[#allocation2] sm:$0x1] %vm1586_vm5, %v1578_v0  ;;  %v1777_v2 = vunpack.c.l.s4 (!%p2017_p12), %v2805_v1 }
 0x171   : > { %1588 = vst.msk [vmem:[#allocation2 + $0x1] sm:$0x1] %vm1586_vm5, %v1579_v3 }
 0x18d   : > { %v1224_v5 = vpop.f32.mrb[2].mxu0 }
 0x18e   : > { %v1580_v6 = vadd.f32 %v1224_v5, %v1012_v14  ;;  %v1294_v7 = vpop.f32.mrb[2].mxu1  ;;  %v2269_v8 = vpop.f32.mrb[3].mxu0 }
 0x18f   : > { %v1581_v20 = vadd.f32 %v1294_v7, %v1013_v16  ;;  %v2304_v9 = vpop.f32.mrb[3].mxu1  ;;  %v1650_v16 = vld [vmem:[#allocation2 + $0x1] sm:$0x1] (!%p2017_p12)  ;;  %v1649_v8 = vld [vmem:[#allocation2] sm:$0x1] (!%p2017_p12) }
 0x190   : > { %1589 = vst.msk [vmem:[#allocation2 + $0x2] sm:$0x1] %vm1586_vm5, %v1580_v6 }
 0x191   : > { %1590 = vst.msk [vmem:[#allocation2 + $0x3] sm:$0x1] %vm1586_vm5, %v1581_v20  ;;  %v1778_v20 = vunpack.c.0.s8 (!%p2017_p12), %v1777_v2 }
 0x196   : > { %v1668_v49 = vpop.permute.xlu0 (!%p2017_p12), %1667 }
 0x197   : > { %v1673_v50 = vrot.slane (!%p2017_p12), %v1668_v49, %v1672_v48  ;;  %v1651_v7 = vld [vmem:[#allocation2 + $0x2] sm:$0x1] (!%p2017_p12) }
 0x198   : > { %v1652_v14 = vld [vmem:[#allocation2 + $0x3] sm:$0x1] (!%p2017_p12) }
 0x19a   : > { %v1677_v52 = vpop.permute.xlu0 (!%p2017_p12), %1676 }
 0x19b   : > { %v1682_v54 = vrot.slane (!%p2017_p12), %v1677_v52, %v1672_v48 }
 0x19c   : > { %v1686_v35 = vpop.permute.xlu1 (!%p2017_p12), %1685 }
 0x19d   : > { %v1691_v38 = vrot.slane (!%p2017_p12), %v1686_v35, %v1672_v48 }
 0x19f   : > { %2721 = vrcp.f32 (!%p2017_p12), %v1691_v38 }
 0x1a0   : > { %v1695_v51 = vpop.permute.xlu1 (!%p2017_p12), %1694  ;;  %2723 = vrcp.f32 (!%p2017_p12), %v1673_v50 }
 0x1a1   : > { %v1700_v53 = vrot.slane (!%p2017_p12), %v1695_v51, %v1672_v48  ;;  %v1704_v57 = vpop.permute.xlu0 (!%p2017_p12), %1703 }
 0x1a2   : > { %v1709_v59 = vrot.slane (!%p2017_p12), %v1704_v57, %v1672_v48 }
 0x1a3   : > { %2725 = vrcp.f32 (!%p2017_p12), %v1700_v53 }
 0x1a4   : > { %2727 = vrcp.f32 (!%p2017_p12), %v1682_v54  ;;  %v1713_v56 = vpop.permute.xlu1 (!%p2017_p12), %1712 }
 0x1a5   : > { %v1718_v58 = vrot.slane (!%p2017_p12), %v1713_v56, %v1672_v48  ;;  %v1722_v61 = vpop.permute.xlu0 (!%p2017_p12), %1721 }
 0x1a6   : > { %v1727_v0 = vrot.slane (!%p2017_p12), %v1722_v61, %v1672_v48 }
 0x1a7   : > { %2729 = vrcp.f32 (!%p2017_p12), %v1718_v58 }
 0x1a8   : > { %2731 = vrcp.f32 (!%p2017_p12), %v1709_v59  ;;  %v1731_v60 = vpop.permute.xlu1 (!%p2017_p12), %1730 }
 0x1a9   : > { %v1736_v62 = vrot.slane (!%p2017_p12), %v1731_v60, %v1672_v48  ;;  %v2722_v3 = vpop.eup (!%p2017_p12), %2721 }
 0x1aa   : > { %v2724_v4 = vpop.eup (!%p2017_p12), %2723 }
 0x1ab   : > { %2733 = vrcp.f32 (!%p2017_p12), %v1736_v62 }
 0x1ac   : > { %2735 = vrcp.f32 (!%p2017_p12), %v1727_v0 }
 0x1ad   : > { %v1364_v13 = vpop.f32.mrb[4].mxu0  ;;  %v2726_v5 = vpop.eup (!%p2017_p12), %2725 }
 0x1ae   : > { %v1582_v15 = vadd.f32 %v1364_v13, %v1014_v10  ;;  %v1434_v17 = vpop.f32.mrb[4].mxu1  ;;  %v2339_v55 = vpop.f32.mrb[5].mxu0  ;;  %v1744_v9 = vmul.f32 (!%p2017_p12), %v2726_v5, %v1652_v14 }
 0x1af   : > { %v1583_v63 = vadd.f32 %v1434_v17, %v1015_v11  ;;  %v2374_v18 = vpop.f32.mrb[5].mxu1  ;;  %v2728_v6 = vpop.eup (!%p2017_p12), %2727  ;;  %v1742_v17 = vmul.f32 (!%p2017_p12), %v2722_v3, %v1651_v7  ;;  %v1738_v55 = vmul.f32 (!%p2017_p12), %v2724_v4, %v1649_v8 }
 0x1b0   : > { %1591 = vst.msk [vmem:[#allocation2 + $0x4] sm:$0x1] %vm1586_vm5, %v1582_v15  ;;  %v1740_v10 = vmul.f32 (!%p2017_p12), %v2728_v6, %v1650_v16  ;;  %v1781_v18 = vsub.s32 (!%p2017_p12), %v1778_v20, %v1671_v47 }
 0x1b1   : > { %1592 = vst.msk [vmem:[#allocation2 + $0x5] sm:$0x1] %vm1586_vm5, %v1583_v63  ;;  %v2730_v15 = vpop.eup (!%p2017_p12), %2729 }
 0x1b2   : > { %v2732_v63 = vpop.eup (!%p2017_p12), %2731 }
 0x1b7   : > { %v1653_v13 = vld [vmem:[#allocation2 + $0x4] sm:$0x1] (!%p2017_p12) }
 0x1b8   : > { %v1654_v11 = vld [vmem:[#allocation2 + $0x5] sm:$0x1] (!%p2017_p12) }
 0x1cb   : > { %1648 = sbr.rel (%p2017_p12) target bundleno = 1016 (0x3f8), region = 123 }
 0x1cd   : > { %v1504_v22 = vpop.f32.mrb[6].mxu0 }
 0x1ce   : > { %v1584_v23 = vadd.f32 %v1504_v22, %v1016_v19  ;;  %v1574_v24 = vpop.f32.mrb[6].mxu1  ;;  %v2409_v25 = vpop.f32.mrb[7].mxu0  ;;  %v1773_v19 = vcombine.low (!%p2017_p12), %v1742_v17, %v1744_v9  ;;  %v1748_v22 = vmul.f32 (!%p2017_p12), %v2730_v15, %v1654_v11 }
 0x1cf   : > { %v1585_v26 = vadd.f32 %v1574_v24, %v1017_v21  ;;  %v2444_v27 = vpop.f32.mrb[7].mxu1  ;;  %v1772_v21 = vcombine.low (!%p2017_p12), %v1738_v55, %v1740_v10 }
 0x1d0   : > { %1593 = vst.msk [vmem:[#allocation2 + $0x6] sm:$0x1] %vm1586_vm5, %v1584_v23  ;;  %v1746_v23 = vmul.f32 (!%p2017_p12), %v2732_v63, %v1653_v13  ;;  %v1789_v32 = vrot.slane (!%p2017_p12), %v1773_v19, %v1781_v18 }
 0x1d1   : > { %1594 = vst.msk [vmem:[#allocation2 + $0x7] sm:$0x1] %vm1586_vm5, %v1585_v26  ;;  %v2734_v26 = vpop.eup (!%p2017_p12), %2733  ;;  %v1782_v31 = vrot.slane (!%p2017_p12), %v1772_v21, %v1781_v18 }
 0x1d2   : > { %v2736_v27 = vpop.eup %2735  ;;  %v1774_v29 = vcombine.low %v1746_v23, %v1748_v22 }
 0x1d3   : > { %v1804_v37 = vcombine.low %v1782_v31, %v1789_v32 }
 0x1d4   : > { %v1796_v34 = vrot.slane %v1774_v29, %v1781_v18 }
 0x1d5   : > { %v1812_v40 = vrot.slane %v1804_v37, %v1781_v18 }
 0x1d7   : > { %v1655_v25 = vld [vmem:[#allocation2 + $0x6] sm:$0x1] }
 0x1d8   : > { %v1656_v24 = vld [vmem:[#allocation2 + $0x7] sm:$0x1]  ;;  %v1750_v30 = vmul.f32 %v2736_v27, %v1655_v25 }
 0x1d9   : > { %v1752_v28 = vmul.f32 %v2734_v26, %v1656_v24 }
 0x1db   : > { %v1775_v33 = vcombine.low %v1750_v30, %v1752_v28 }
 0x1dd   : > { %v1803_v36 = vrot.slane %v1775_v33, %v1781_v18 }
 0x1df   : > { %v1805_v39 = vcombine.low %v1796_v34, %v1803_v36 }
 0x1e1   : > { %v1819_v41 = vrot.slane %v1805_v39, %v1781_v18 }
 0x1e3   : > { %v1820_v42 = vcombine.low %v1812_v40, %v1819_v41 }
 0x1e5   : > { %2454 = vmatmul.mubr.msk.f32.vlgmr.msra.gmra.mrb[0].mxu0 %vm1821_vm7, %v1820_v42 }
 0x2b8   : > { %v1890_v44 = vpop.f32.mrb[0].mxu0 }
 0x2b9   : > { %v1891_v45 = vadd.f32 %v2018_v43, %v1890_v44  ;;  %v2455_v12 = vpop.f32.mrb[1].mxu0 }
 0x2bb   : > { %v1895_v46 = vsel %vm1894_vm8, %v1891_v45, -inf }
 0x2bc   : > { %1896 = vmax.xlane.f32.xlu0 %v1895_v46 }
 0x349   : > { %v1897_v47 = vpop.xlane.xlu0 %1896 }
 0x34a   : > { %v1898_v48 = vsub.f32 %v1891_v45, %v1897_v47 }
 0x34c   : > { %v1899_v35 = vmul.f32 1.442695, %v1898_v48 }
 0x34e   : > { %2737 = vpow2.f32 %v1899_v35 }
 0x358   : > { %v2738_v49 = vpop.eup %2737 }
 0x359   : > { %v1901_v38 = vsel %vm1894_vm8, %v2738_v49, 0.0 }
 0x35a   : > { %1902 = vadd.xlane.f32.xlu1 %v1901_v38 }
 0x3e7   : > { %v1903_v50 = vpop.xlane.xlu1 %1902 }
 0x3e8   : > { %2739 = vlog2.f32 %v1903_v50 }
 0x3f2   : > { %v2740_v51 = vpop.eup %2739 }
 0x3f3   : > { %v1905_v52 = vmul.f32 0.6931472, %v2740_v51 }
 0x3f5   : > { %v1906_v53 = vsub.f32 %v1898_v48, %v1905_v52 }
 0x3f7   : > { %1907 = vst.msk [vmem:[%s3173_s12] sm:$0xff] %vm1894_vm8, %v1906_v53 }
 0x3f8 PF: > { %s14_s21 = sadd.s32 1, %s2795_s21   ;;  %s3503_s15 = smov %s2775_s16 }
 0x3f9   : > { %p11_p13 = scmp.ge.s32.totalorder %s14_s21, 6   ;;  %s3504_s16 = smov %s2886_s29 }
 0x3fa   : > { %s3505_s17 = smov %s2787_s19  ;;  %s3506_s18 = smov %s2791_s20 }
 0x3fb   : > { %s3507_s19 = smov %s3510_s22  ;;  %s3508_s20 = smov %s3514_s23 }
 0x3fc   :  { %13 = sbr.rel (!%p11_p13) target bundleno = 4 (0x4), region = 166 }

</bundles_post_ra>
